<compile_context>
chip_gen: v6e
topology: v6e:2x2x1
jax: 0.10.0
libtpu: 0.0.40
codegen_flags: <defaults>
</compile_context>

<pallas_src>
import functools

import jax
import jax.numpy as jnp
from jax.experimental import pallas as pl
from jax.experimental.pallas import tpu as pltpu


def _conv_relu_kernel(x_ref, w_ref, o_ref, *, H, W, Cin, Cout_store, per_tap):
    # x_ref: (nb, H+2, W+2, Cin)      bf16 pre-padded input tile (auto-DMA'd)
    # w_ref: (9*Cin, Cout_blk)        bf16 resident / Cout-tiled weight slab
    # o_ref: (nb, H, W, Cout_store)   output tile, exact channel count (no pad)
    nb = x_ref.shape[0]
    Cout_blk = w_ref.shape[-1]
    M = nb * H * W

    if per_tap:
        # 9 accumulated matmuls with K = Cin (>= 128): full MXU K per dot, no
        # (M, 9*Cin) concat temporary; f32 accumulation (MRB in-place on v7x).
        acc = None
        for ky in range(3):
            for kx in range(3):
                tap = x_ref[:, ky:ky + H, kx:kx + W, :].reshape(M, Cin)
                t = ky * 3 + kx
                wk = w_ref[t * Cin:(t + 1) * Cin, :]
                d = jnp.dot(tap, wk, preferred_element_type=jnp.float32)
                acc = d if acc is None else acc + d
    else:
        # Small-Cin layers: one fused matmul with K = 9*Cin; the im2col temp
        # is only M * 9*Cin bf16 bytes here.
        # TODO(synk): for Cin << 128 a lane-merged (N, H, (W+2)*Cin) input
        # layout with pltpu.roll-built kx shifts would make the LHS lane-dense.
        taps = []
        for ky in range(3):
            for kx in range(3):
                taps.append(x_ref[:, ky:ky + H, kx:kx + W, :].reshape(M, Cin))
        patches = jnp.concatenate(taps, axis=1)                  # (M, 9*Cin)
        acc = jnp.dot(patches, w_ref[...], preferred_element_type=jnp.float32)

    out = jnp.maximum(acc, 0.0)
    if Cout_store != Cout_blk:
        out = out[:, :Cout_store]          # drop weight lane padding pre-store
    # TODO(synk): for very small Cout a merged (N, H, W*Cout) lane-dense slab
    # would also make the VMEM stores unmasked; exact NHWC kept here to avoid
    # a minor-dim-changing reshape.
    o_ref[...] = out.reshape(nb, H, W, Cout_store).astype(o_ref.dtype)


def _round_up(x, m):
    return -(-x // m) * m


def _vmem_capacity_bytes():
    """Per-generation VMEM capacity (64 MiB/TC v7x, 128 MiB v5e/v6e)."""
    try:
        info = pltpu.get_tpu_info()
        cap = getattr(info, "vmem_capacity_bytes", None)
        if cap:
            return int(cap)
    except Exception:
        pass
    return 64 * 1024 * 1024   # conservative fallback = v7x per-core VMEM


def _tile_vmem_bytes(shape, itemsize):
    """Physical VMEM footprint of one tile (last dim -> 128 lanes, 2nd-last -> 8 sublanes)."""
    s = list(shape)
    s[-1] = _round_up(s[-1], 128)
    if len(s) >= 2:
        s[-2] = _round_up(s[-2], 8)
    n = 1
    for d in s:
        n *= d
    return n * itemsize


def _per_step_bytes(nb, H, W, Cin, Cout_blk, Cout_store, out_itemsize, per_tap):
    in_blk = _tile_vmem_bytes((nb, H + 2, W + 2, Cin), 2)        # bf16
    w_blk = _tile_vmem_bytes((9 * Cin, Cout_blk), 2)             # bf16
    out_blk = _tile_vmem_bytes((nb, H, W, Cout_store), out_itemsize)
    acc_tmp = _tile_vmem_bytes((nb * H * W, Cout_blk), 4)        # f32 accumulator
    lhs_tmp = _tile_vmem_bytes((nb * H * W, Cin if per_tap else 9 * Cin), 2)
    # 2x: BlockSpec double-buffers inputs and outputs.
    # TODO(synk): pipeline_mode=pl.Buffered(1) on the constant-index weight
    # slab would drop one of the two weight buffers once verified supported.
    return 2 * in_blk + 2 * w_blk + 2 * out_blk + acc_tmp + lhs_tmp


def _pick_nb(N, H, W, step_bytes_fn, budget, target_rows=512):
    """Byte-based batch-tile selection against the per-generation VMEM budget."""
    divisors = [d for d in range(1, N + 1) if N % d == 0]
    feasible = [d for d in divisors if step_bytes_fn(d) <= budget] or [1]
    # Prefer: (a) keep >= 2 batch grid steps (megacore / v7x's 2 TCs),
    #         (b) fill the 256-wide MXU M dim (>= target_rows rows),
    #         (c) the smallest tile that does both (deepest grid / pipelining).
    return max(feasible, key=lambda d: (N // d >= 2, d * H * W >= target_rows, -d))


def conv_relu_nhwc(x_nhwc, weight_oihw, *, compute_dtype=jnp.bfloat16,
                   out_dtype=None):
    """x_nhwc: (N, H, W, Cin); weight_oihw: (Cout, Cin, 3, 3). Returns NHWC."""
    N, H, W, Cin = x_nhwc.shape
    Cout = weight_oihw.shape[0]
    assert weight_oihw.shape == (Cout, Cin, 3, 3)
    out_dtype = x_nhwc.dtype if out_dtype is None else out_dtype
    out_itemsize = jnp.dtype(out_dtype).itemsize

    per_tap = Cin >= 128

    # Output-channel tiling: the output array always has exactly Cout channels
    # (no padded writeback).  When Cout % 128 == 0 tile it (256-wide when
    # possible); otherwise pad only the resident WEIGHT slab to 128 lanes and
    # slice the accumulator in-kernel before the store.
    if Cout % 128 == 0:
        tcout = 256 if Cout % 256 == 0 else 128
        cout_blk = tcout
        cout_store = tcout
        n_cout_tiles = Cout // tcout
    else:
        cout_blk = _round_up(Cout, 128)
        cout_store = Cout
        n_cout_tiles = 1

    # Zero-pad the input once in HBM (a single extra HBM pass over the input)
    # so the kernel does no per-step halo zeroing / VMEM->VMEM interior copy.
    x_pad = jnp.pad(x_nhwc.astype(compute_dtype),
                    ((0, 0), (1, 1), (1, 1), (0, 0)))

    # (Cout, Cin, 3, 3) -> (3, 3, Cin, Cout) -> (9*Cin, Cout[_pad]), bf16.
    # K ordering = (ky*3 + kx)*Cin + c, matching the in-kernel tap order.
    w2d = jnp.transpose(weight_oihw, (2, 3, 1, 0)).reshape(9 * Cin, Cout)
    if n_cout_tiles == 1 and cout_blk != Cout:
        w2d = jnp.pad(w2d, ((0, 0), (0, cout_blk - Cout)))
    w2d = w2d.astype(compute_dtype)

    # Generation-aware, byte-based tile selection and VMEM limit.
    cap = _vmem_capacity_bytes()
    budget = int(cap * 0.7)
    step_bytes = functools.partial(_per_step_bytes, H=H, W=W, Cin=Cin,
                                   Cout_blk=cout_blk, Cout_store=cout_store,
                                   out_itemsize=out_itemsize, per_tap=per_tap)
    nb = _pick_nb(N, H, W, step_bytes, budget)
    est = step_bytes(nb)
    vmem_limit = int(min(cap, max(int(est * 1.5), 8 * 1024 * 1024)))
    # TODO(synk): if est exceeds the budget even at nb=1, tile H into row bands
    # with a 1-row halo (overlapping DMA) instead of relying on nb alone.

    kernel = functools.partial(_conv_relu_kernel, H=H, W=W, Cin=Cin,
                               Cout_store=cout_store, per_tap=per_tap)

    if Cout % 128 == 0:
        grid = (N // nb, n_cout_tiles)
        in_specs = [
            pl.BlockSpec((nb, H + 2, W + 2, Cin), lambda n, co: (n, 0, 0, 0)),
            pl.BlockSpec((9 * Cin, cout_blk), lambda n, co: (0, co)),
        ]
        out_specs = pl.BlockSpec((nb, H, W, cout_blk),
                                 lambda n, co: (n, 0, 0, co))
        dim_sem = ("parallel", "parallel")
    else:
        grid = (N // nb,)
        in_specs = [
            pl.BlockSpec((nb, H + 2, W + 2, Cin), lambda n: (n, 0, 0, 0)),
            pl.BlockSpec((9 * Cin, cout_blk), lambda n: (0, 0)),
        ]
        out_specs = pl.BlockSpec((nb, H, W, Cout), lambda n: (n, 0, 0, 0))
        dim_sem = ("parallel",)

    return pl.pallas_call(
        kernel,
        out_shape=jax.ShapeDtypeStruct((N, H, W, Cout), out_dtype),
        grid_spec=pltpu.PrefetchScalarGridSpec(
            num_scalar_prefetch=0,
            grid=grid,
            in_specs=in_specs,
            out_specs=out_specs,
        ),
        compiler_params=pltpu.CompilerParams(
            dimension_semantics=dim_sem,
            vmem_limit_bytes=vmem_limit,
        ),
    )(x_pad, w2d)


def conv_relu(x_nchw, weight_oihw, **kwargs):
    """PyTorch-style entry: x (N, Cin, H, W), weight (Cout, Cin, 3, 3) -> NCHW."""
    x_nhwc = jnp.transpose(x_nchw, (0, 2, 3, 1))
    out_nhwc = conv_relu_nhwc(x_nhwc, weight_oihw, **kwargs)
    return jnp.transpose(out_nhwc, (0, 3, 1, 2))


def _ref_conv_relu(x_nchw, weight_oihw, compute_dtype=jnp.bfloat16):
    # Reference with the same bf16 rounding of inputs as the kernel; exact
    # f32 convolution (matches MXU bf16 products + f32 accumulation).
    xr = x_nchw.astype(compute_dtype).astype(jnp.float32)
    wr = weight_oihw.astype(compute_dtype).astype(jnp.float32)
    out = jax.lax.conv_general_dilated(
        xr, wr, window_strides=(1, 1), padding=((1, 1), (1, 1)),
        dimension_numbers=("NCHW", "OIHW", "NCHW"),
        precision=jax.lax.Precision.HIGHEST)
    return jnp.maximum(out, 0.0)


if __name__ == "__main__":
    key = jax.random.PRNGKey(0)
    k1, k2, k3, k4 = jax.random.split(key, 4)

    # --- Case 1: module-spec small shapes (small Cin/Cout -> fused-K path) ---
    N, Cin, Cout, H, W = 2, 4, 8, 16, 16
    x = jax.random.normal(k1, (N, Cin, H, W), dtype=jnp.float32)
    weight = jax.random.normal(k2, (Cout, Cin, 3, 3), dtype=jnp.float32) * 0.1

    out = jax.block_until_ready(conv_relu(x, weight))
    assert out.shape == (N, Cout, H, W)
    ref = _ref_conv_relu(x, weight)
    err = float(jnp.max(jnp.abs(out.astype(jnp.float32) - ref)))
    assert jnp.allclose(out.astype(jnp.float32), ref, atol=1e-2, rtol=1e-2), err

    # --- Case 2: wide layer (per-tap accumulated matmuls + Cout tiling) ---
    N2, Cin2, Cout2, H2, W2 = 2, 128, 512, 8, 8
    x2 = jax.random.normal(k3, (N2, Cin2, H2, W2), dtype=jnp.float32)
    w2 = jax.random.normal(k4, (Cout2, Cin2, 3, 3), dtype=jnp.float32) * 0.05

    out2 = jax.block_until_ready(conv_relu(x2, w2))
    assert out2.shape == (N2, Cout2, H2, W2)
    ref2 = _ref_conv_relu(x2, w2)
    err2 = float(jnp.max(jnp.abs(out2.astype(jnp.float32) - ref2)))
    assert jnp.allclose(out2.astype(jnp.float32), ref2, atol=2e-2, rtol=2e-2), err2

    print("KERNEL_OK")
</pallas_src>

<mosaic_0001>
module attributes {stable_mosaic.version = 11 : i64} {
  func.func @_conv_relu_kernel(%arg0: i32, %arg1: memref<1x18x18x4xbf16, #tpu.memory_space<vmem>>, %arg2: memref<36x128xbf16, #tpu.memory_space<vmem>>, %arg3: memref<1x16x16x8xf32, #tpu.memory_space<vmem>>) attributes {dimension_semantics = [#tpu.dimension_semantics<parallel>], iteration_bounds = array<i64: 2>, scalar_prefetch = 0 : i64, scratch_operands = 0 : i64, tpu.core_type = #tpu.core_type<tc>, window_params = [{transform_indices = @transform_0, window_bounds = array<i64: 1, 18, 18, 4>}, {pipeline_mode = #tpu.pipeline_mode<synchronous>, transform_indices = @transform_1, window_bounds = array<i64: 36, 128>}, {transform_indices = @transform_2, window_bounds = array<i64: 1, 16, 16, 8>}]} {
    %c0 = arith.constant 0 : index
    %c0_0 = arith.constant 0 : index
    %c0_1 = arith.constant 0 : index
    %c0_2 = arith.constant 0 : index
    %0 = vector.load %arg1[%c0, %c0_0, %c0_1, %c0_2] : memref<1x18x18x4xbf16, #tpu.memory_space<vmem>>, vector<1x16x16x4xbf16>
    %1 = vector.shape_cast %0 : vector<1x16x16x4xbf16> to vector<256x4xbf16>
    %c0_3 = arith.constant 0 : index
    %c0_4 = arith.constant 0 : index
    %c1 = arith.constant 1 : index
    %c0_5 = arith.constant 0 : index
    %2 = vector.load %arg1[%c0_3, %c0_4, %c1, %c0_5] : memref<1x18x18x4xbf16, #tpu.memory_space<vmem>>, vector<1x16x16x4xbf16>
    %3 = vector.shape_cast %2 : vector<1x16x16x4xbf16> to vector<256x4xbf16>
    %c0_6 = arith.constant 0 : index
    %c0_7 = arith.constant 0 : index
    %c2 = arith.constant 2 : index
    %c0_8 = arith.constant 0 : index
    %4 = vector.load %arg1[%c0_6, %c0_7, %c2, %c0_8] : memref<1x18x18x4xbf16, #tpu.memory_space<vmem>>, vector<1x16x16x4xbf16>
    %5 = vector.shape_cast %4 : vector<1x16x16x4xbf16> to vector<256x4xbf16>
    %c0_9 = arith.constant 0 : index
    %c1_10 = arith.constant 1 : index
    %c0_11 = arith.constant 0 : index
    %c0_12 = arith.constant 0 : index
    %6 = vector.load %arg1[%c0_9, %c1_10, %c0_11, %c0_12] : memref<1x18x18x4xbf16, #tpu.memory_space<vmem>>, vector<1x16x16x4xbf16>
    %7 = vector.shape_cast %6 : vector<1x16x16x4xbf16> to vector<256x4xbf16>
    %c0_13 = arith.constant 0 : index
    %c1_14 = arith.constant 1 : index
    %c1_15 = arith.constant 1 : index
    %c0_16 = arith.constant 0 : index
    %8 = vector.load %arg1[%c0_13, %c1_14, %c1_15, %c0_16] : memref<1x18x18x4xbf16, #tpu.memory_space<vmem>>, vector<1x16x16x4xbf16>
    %9 = vector.shape_cast %8 : vector<1x16x16x4xbf16> to vector<256x4xbf16>
    %c0_17 = arith.constant 0 : index
    %c1_18 = arith.constant 1 : index
    %c2_19 = arith.constant 2 : index
    %c0_20 = arith.constant 0 : index
    %10 = vector.load %arg1[%c0_17, %c1_18, %c2_19, %c0_20] : memref<1x18x18x4xbf16, #tpu.memory_space<vmem>>, vector<1x16x16x4xbf16>
    %11 = vector.shape_cast %10 : vector<1x16x16x4xbf16> to vector<256x4xbf16>
    %c0_21 = arith.constant 0 : index
    %c2_22 = arith.constant 2 : index
    %c0_23 = arith.constant 0 : index
    %c0_24 = arith.constant 0 : index
    %12 = vector.load %arg1[%c0_21, %c2_22, %c0_23, %c0_24] : memref<1x18x18x4xbf16, #tpu.memory_space<vmem>>, vector<1x16x16x4xbf16>
    %13 = vector.shape_cast %12 : vector<1x16x16x4xbf16> to vector<256x4xbf16>
    %c0_25 = arith.constant 0 : index
    %c2_26 = arith.constant 2 : index
    %c1_27 = arith.constant 1 : index
    %c0_28 = arith.constant 0 : index
    %14 = vector.load %arg1[%c0_25, %c2_26, %c1_27, %c0_28] : memref<1x18x18x4xbf16, #tpu.memory_space<vmem>>, vector<1x16x16x4xbf16>
    %15 = vector.shape_cast %14 : vector<1x16x16x4xbf16> to vector<256x4xbf16>
    %c0_29 = arith.constant 0 : index
    %c2_30 = arith.constant 2 : index
    %c2_31 = arith.constant 2 : index
    %c0_32 = arith.constant 0 : index
    %16 = vector.load %arg1[%c0_29, %c2_30, %c2_31, %c0_32] : memref<1x18x18x4xbf16, #tpu.memory_space<vmem>>, vector<1x16x16x4xbf16>
    %17 = vector.shape_cast %16 : vector<1x16x16x4xbf16> to vector<256x4xbf16>
    %18 = tpu.concatenate %1, %3, %5, %7, %9, %11, %13, %15, %17 in 1 : vector<256x4xbf16>, vector<256x4xbf16>, vector<256x4xbf16>, vector<256x4xbf16>, vector<256x4xbf16>, vector<256x4xbf16>, vector<256x4xbf16>, vector<256x4xbf16>, vector<256x4xbf16> -> vector<256x36xbf16>
    %c0_33 = arith.constant 0 : index
    %c0_34 = arith.constant 0 : index
    %19 = vector.load %arg2[%c0_33, %c0_34] : memref<36x128xbf16, #tpu.memory_space<vmem>>, vector<36x128xbf16>
    %cst = arith.constant dense<0.000000e+00> : vector<256x128xf32>
    %20 = tpu.matmul %18, %19, %cst {dimension_numbers = #tpu.dot_dimension_numbers<[1], [0], [0], [1], [0, 0, 1, 1], [], []>} : vector<256x36xbf16>, vector<36x128xbf16>, vector<256x128xf32> -> vector<256x128xf32>
    %cst_35 = arith.constant 0.000000e+00 : f32
    %21 = vector.broadcast %cst_35 : f32 to vector<256x128xf32>
    %22 = arith.maximumf %20, %21 : vector<256x128xf32>
    %23 = vector.extract_strided_slice %22 {offsets = [0, 0], sizes = [256, 8], strides = [1, 1]} : vector<256x128xf32> to vector<256x8xf32>
    %24 = vector.shape_cast %23 : vector<256x8xf32> to vector<1x16x16x8xf32>
    %c0_36 = arith.constant 0 : index
    %c0_37 = arith.constant 0 : index
    %c0_38 = arith.constant 0 : index
    %c0_39 = arith.constant 0 : index
    %25 = vector.load %arg3[%c0_36, %c0_37, %c0_38, %c0_39] : memref<1x16x16x8xf32, #tpu.memory_space<vmem>>, vector<1x16x16x8xf32>
    tpu.vector_store %arg3[%c0_36, %c0_37, %c0_38, %c0_39], %24 {strides = array<i32>} : memref<1x16x16x8xf32, #tpu.memory_space<vmem>>, vector<1x16x16x8xf32>,
    return
  }
  func.func @transform_0(%arg0: i32) -> (i32, i32, i32, i32) {
    %c0_i32 = arith.constant 0 : i32
    %c0_i32_0 = arith.constant 0 : i32
    %c0_i32_1 = arith.constant 0 : i32
    %c0_i32_2 = arith.constant 0 : i32
    return %arg0, %c0_i32, %c0_i32_0, %c0_i32_1 : i32, i32, i32, i32
  }
  func.func @transform_1(%arg0: i32) -> (i32, i32) {
    %c0_i32 = arith.constant 0 : i32
    %c0_i32_0 = arith.constant 0 : i32
    %c0_i32_1 = arith.constant 0 : i32
    return %c0_i32, %c0_i32_0 : i32, i32
  }
  func.func @transform_2(%arg0: i32) -> (i32, i32, i32, i32) {
    %c0_i32 = arith.constant 0 : i32
    %c0_i32_0 = arith.constant 0 : i32
    %c0_i32_1 = arith.constant 0 : i32
    %c0_i32_2 = arith.constant 0 : i32
    return %arg0, %c0_i32, %c0_i32_0, %c0_i32_1 : i32, i32, i32, i32
  }
}

</mosaic_0001>

<bundles_post_ra>
// kernel: tpu_custom_call.1
= control target key start
LH: loop header
LB: loop body
LE: loop exit
PB: predicated region body
PF: predicated region fallthrough
CT: control target
= control target key end

     0   :  { %s3875_s9 = smov 0   ;;  %s5801_s0 = inlined_call_operand.vmem [shape: bf16[2,18,18,4], index: 0, kind: input, shape index: {}]   ;;  %s5802_s1 = inlined_call_operand.vmem [shape: bf16[36,128], index: 1, kind: input, shape index: {}]   ;;  %s5803_s2 = inlined_call_operand.vmem [shape: f32[2,16,16,8], index: 2, kind: output, shape index: {}]  }
   0x1 LB: > { %s3330_s10 = sadd.s32 4294967295, %s3850_s9   ;;  %p3334_p0 = scmp.ge.s32.totalorder %s3850_s9, 1  ;;  %s3850_s9 = sphi %s3875_s9, %s12_s9  }
   0x2   : > { %p112_p1 = scmp.lt.s32.totalorder %s3850_s9, 3 }
   0x4   : > { %p113_p2 = pnand %p3334_p0, %p112_p1 }
   0x5   : > { %p134_p3 = scmp.lt.s32.totalorder (!%p113_p2), %s3330_s10, 1  ;;  %s3852_s15 = smov (!%p113_p2), 12  }
   0x6   : > { %116 = sbr.rel (%p113_p2) target bundleno = 655 (0x28f), region = 28  ;;  %s3853_s16 = smov (!%p113_p2), 8  }
   0x7   : > { %s3854_s17 = smov (!%p113_p2), 4   ;;  %s3855_s18 = smov (!%p113_p2), 16  }
   0x8   : > { %s3856_s19 = smov (!%p113_p2), 20   ;;  %s3857_s20 = smov (!%p113_p2), 24  }
   0x9   : > { %s3858_s21 = smov (!%p113_p2), 28   ;;  %s3859_s22 = smov (!%p113_p2), 32  }
   0xb   : > { %s5809_s10 = smov (!%p134_p3, %s3330_s10), 1  ;;  %vm644_vm0 = vcmask 1042432   ;;  %vm645_vm1 = vcmask 1046532   ;;  %vm193_vm3 = vsmask.f32 3328  ;;  %vm2713_vm6 = vcmask 31744  }
   0xc   : > { %s3745_s11 = smul.u32 216, %s5809_s10  ;;  %vm3920_vm2 = vmor %vm644_vm0, %vm645_vm1  ;;  %vm194_vm4 = vsmask.f32 7440  ;;  %vm2762_vm7 = vcmask 64512   ;;  %vm2795_vm8 = vcmask 97280   ;;  %vm2828_vm9 = vcmask 130048  }
   0xd   : > { %vm3978_vm5 = vmor %vm193_vm3, %vm194_vm4  ;;  %vm2861_vm10 = vcmask 162816   ;;  %vm2894_vm11 = vcmask 195584   ;;  %vm2927_vm12 = vcmask 228352   ;;  %vm3046_vm13 = vcmask 1041408   ;;  %s3679_s29 = sshll.u32 %s5809_s10, 8 }
   0xe   : > { %s3889_s14 = scalar_lea.vmem %s5801_s0, %s3745_s11  ;;  %vm2960_vm14 = vcmask 261120   ;;  %vm3013_vm15 = vcmask 293888   ;;  %s5665_s4 = scalar_lea.vmem %s5803_s2, %s3679_s29 }
   0xf   : > { %v3370_v0 = vld [vmem:[%s3889_s14 + $0x6c] sm:$0xf]  ;;  %v3893_v1 = vld [vmem:[%s3889_s14 + $0x70] sm:$0xf]  ;;  %v3906_v12 = vld [vmem:[%s3889_s14 + $0x64] sm:$0xf] }
  0x10   : > { %v3354_v2 = vld [vmem:[%s3889_s14 + $0xc] sm:$0xf]  ;;  %v1010_v3 = vshll.u32 %v3893_v1, 16  ;;  %v1014_v4 = vshrl.u32 %v3893_v1, 16  ;;  %v3570_v5 = vcombine.low %v3370_v0, %v3893_v1  ;;  %v1001_v6 = vshrl.u32 %v3370_v0, 16 }
  0x11   : > { %v3900_v7 = vld [vmem:[%s3889_s14 + $0x10] sm:$0xf]  ;;  %v1004_v8 = vshll.u32 %v3370_v0, 16  ;;  %v809_v15 = vshrl.u32 %v3354_v2, 16  ;;  %v812_v16 = vshll.u32 %v3354_v2, 16  ;;  %v705_v22 = vrot.slane %v3906_v12, 5 }
  0x12   : > { %v818_v9 = vshll.u32 %v3900_v7, 16  ;;  %v822_v10 = vshrl.u32 %v3900_v7, 16  ;;  %v3562_v11 = vcombine.low %v3354_v2, %v3900_v7  ;;  %v3908_v13 = vrot.slane %v1014_v4, 4  ;;  %2281 = vrot.lane.b32.xlu1 %v3570_v5, %s3852_s15  ;;  %v3912_v17 = vld [vmem:[%s3889_s14 + $0x68] sm:$0x1] }
  0x13   : > { %v1003_v14 = vrot.slane %v1001_v6, 4  ;;  %v1006_v18 = vrot.slane %v1004_v8, 5  ;;  %v588_v20 = vld [vmem:[%s3889_s14 + $0x60] sm:$0xe]  ;;  %v708_v23 = vrot.slane %v3912_v17, 5  ;;  %v811_v24 = vrot.slane %v809_v15, 4 }
  0x14   : > { %v3914_v19 = vrot.slane %v822_v10, 4  ;;  %2265 = vrot.lane.b32.xlu0 %v3562_v11, %s3852_s15  ;;  %v814_v25 = vrot.slane %v812_v16, 5  ;;  %v3346_v26 = vrot.slane %v588_v20, 9  ;;  %v3927_v27 = vld [vmem:[%s3889_s14 + $0x4] sm:$0xf]  ;;  %v398_v28 = vshll.u32 %v3906_v12, 16 }
  0x15   : > { %v1007_v29 = vor.u32 %v1006_v18, %v1003_v14  ;;  %v707_v30 = vrot.slane %v705_v22, 4  ;;  %v3931_v31 = vld [vmem:[%s3889_s14 + $0x8] sm:$0x1]  ;;  %v580_v32 = vld [vmem:[%s3889_s14] sm:$0xe]  ;;  %v649_v33 = vrot.slane %v3927_v27, 5 }
  0x16   : > { %v815_v34 = vor.u32 %v814_v25, %v811_v24  ;;  %v706_v35 = vsel %vm3920_vm2, %v3346_v26, %v705_v22  ;;  %v3338_v36 = vrot.slane %v580_v32, 9  ;;  %v652_v37 = vrot.slane %v3931_v31, 5  ;;  %v3939_v38 = vld [vmem:[%s3889_s14 + $0x70] sm:$0xf]  ;;  %v3942_v39 = vld [vmem:[%s3889_s14 + $0x74] sm:$0x1] }
  0x17   : > { %v3944_v40 = vrot.slane %v1007_v29, 4  ;;  %v709_v41 = vsel %vm3920_vm2, %v707_v30, %v708_v23  ;;  %v651_v42 = vrot.slane %v649_v33, 4  ;;  %v589_v43 = vld [vmem:[%s3889_s14 + $0x6c] sm:$0xe]  ;;  %v712_v44 = vrot.slane %v3939_v38, 5 }
  0x18   : > { %v3950_v45 = vrot.slane %v815_v34, 4  ;;  %v3554_v46 = vcombine.low %v706_v35, %v709_v41  ;;  %v650_v47 = vsel %vm3920_vm2, %v3338_v36, %v649_v33  ;;  %v3347_v48 = vrot.slane %v589_v43, 9  ;;  %v148_v49 = vld [vmem:[%s3889_s14 + $0x10] sm:$0xf]  ;;  %v178_v50 = vld [vmem:[%s3889_s14 + $0x14] sm:$0x1] }
  0x19   : > { %v653_v51 = vsel %vm3920_vm2, %v651_v42, %v652_v37  ;;  %v714_v52 = vrot.slane %v712_v44, 4  ;;  %v715_v53 = vrot.slane %v3942_v39, 5  ;;  %v581_v54 = vld [vmem:[%s3889_s14 + $0xc] sm:$0xe]  ;;  %v656_v55 = vrot.slane %v148_v49, 5 }
  0x1a   : > { %2185 = vrot.lane.b32.xlu1 %v3554_v46, %s3853_s16  ;;  %v3546_v56 = vcombine.low %v650_v47, %v653_v51  ;;  %v713_v57 = vsel %vm3920_vm2, %v3347_v48, %v712_v44  ;;  %v3339_v58 = vrot.slane %v581_v54, 9  ;;  %v659_v59 = vrot.slane %v178_v50, 5  ;;  %v147_v60 = vld [vmem:[%s3889_s14 + $0xc] sm:$0xf]  ;;  %v145_v2 = vld [vmem:[%s3889_s14] sm:$0xf] }
  0x1b   : > { %v716_v61 = vsel %vm3920_vm2, %v714_v52, %v715_v53  ;;  %v658_v62 = vrot.slane %v656_v55, 4  ;;  %v221_v63 = vshrl.u32 %v147_v60, 16  ;;  %v224_v0 = vshll.u32 %v147_v60, 16  ;;  %v163_v23 = vld [vmem:[%s3889_s14 + $0x6c] sm:$0xf] }
  0x1c   : > { %2169 = vrot.lane.b32.xlu0 %v3546_v56, %s3853_s16  ;;  %v3555_v4 = vcombine.low %v713_v57, %v716_v61  ;;  %v657_v5 = vsel %vm3920_vm2, %v3339_v58, %v656_v55  ;;  %v230_v6 = vshll.u32 %v148_v49, 16  ;;  %v234_v8 = vshrl.u32 %v148_v49, 16  ;;  %v161_v52 = vld [vmem:[%s3889_s14 + $0x60] sm:$0xf]  ;;  %v3831_v21 = vld [vmem:[%s3889_s14 + $0x30] sm:$0xf] }
  0x1d   : > { %v660_v10 = vsel %vm3920_vm2, %v658_v62, %v659_v59  ;;  %v223_v11 = vrot.slane %v221_v63, 4  ;;  %v226_v14 = vrot.slane %v224_v0, 5  ;;  %v240_v15 = vshll.u32 %v178_v50, 16 }
  0x1e   : > { %2187 = vrot.lane.b32.xlu1 %v3555_v4, %s3853_s16  ;;  %v3547_v16 = vcombine.low %v657_v5, %v660_v10  ;;  %v232_v18 = vrot.slane %v230_v6, 5  ;;  %v236_v20 = vrot.slane %v234_v8, 4  ;;  %v197_v22 = vshrl.u32 %v145_v2, 16  ;;  %v3372_v4 = vld [vmem:[%s3889_s14 + $0x78] sm:$0xf] }
  0x1f   : > { %v227_v24 = vor.u32 %v226_v14, %v223_v11  ;;  %v242_v25 = vrot.slane %v240_v15, 5  ;;  %v200_v26 = vshll.u32 %v145_v2, 16  ;;  %v206_v29 = vshll.u32 %v3927_v27, 16  ;;  %v4001_v10 = vld [vmem:[%s3889_s14 + $0x7c] sm:$0xf] }
  0x20   : > { %2171 = vrot.lane.b32.xlu0 %v3547_v16, %s3853_s16  ;;  %v237_v32 = vor.u32 %v236_v20, %v232_v18  ;;  %v199_v33 = vrot.slane %v197_v22, 4  ;;  %v210_v34 = vshrl.u32 %v3927_v27, 16  ;;  %v216_v35 = vshll.u32 %v3931_v31, 16 }
  0x21   : > { %v228_v36 = vrot.slane %v227_v24, 4  ;;  %v202_v37 = vrot.slane %v200_v26, 5  ;;  %v208_v41 = vrot.slane %v206_v29, 5  ;;  %v413_v42 = vshrl.u32 %v163_v23, 16 }
  0x22   : > { %v238_v43 = vrot.slane %v237_v32, 4  ;;  %v212_v44 = vrot.slane %v210_v34, 4  ;;  %v218_v46 = vrot.slane %v216_v35, 5  ;;  %v416_v47 = vshll.u32 %v163_v23, 16  ;;  %v4008_v23 = vld [vmem:[%s3889_s14 + $0x18] sm:$0xf] }
  0x23   : > { %v233_v48 = vsel %vm3978_vm5, %v228_v36, %v232_v18  ;;  %v203_v49 = vor.u32 %v202_v37, %v199_v33  ;;  %v415_v50 = vrot.slane %v413_v42, 4  ;;  %v422_v51 = vshll.u32 %v3939_v38, 16  ;;  %v4019_v35 = vld [vmem:[%s3889_s14 + $0x74] sm:$0x1] }
  0x24   : > { %v243_v27 = vsel %vm3978_vm5, %v238_v43, %v242_v25  ;;  %v213_v31 = vor.u32 %v212_v44, %v208_v41  ;;  %v418_v53 = vrot.slane %v416_v47, 5  ;;  %v426_v54 = vshrl.u32 %v3939_v38, 16 }
  0x25   : > { %v3531_v55 = vcombine.low %v233_v48, %v243_v27  ;;  %v204_v56 = vrot.slane %v203_v49, 4  ;;  %v424_v57 = vrot.slane %v422_v51, 5  ;;  %v432_v58 = vshll.u32 %v3942_v39, 16  ;;  %v4029_v48 = vld [vmem:[%s3889_s14 + $0x14] sm:$0x1] }
  0x26   : > { %v214_v59 = vrot.slane %v213_v31, 4  ;;  %v419_v60 = vor.u32 %v418_v53, %v415_v50  ;;  %v428_v61 = vrot.slane %v426_v54, 4  ;;  %v389_v62 = vshrl.u32 %v161_v52, 16 }
  0x27   : > { %2091 = vrot.lane.b32.xlu1 %v3531_v55, %s3854_s17  ;;  %v209_v63 = vsel %vm3978_vm5, %v204_v56, %v208_v41  ;;  %v434_v0 = vrot.slane %v432_v58, 5  ;;  %v392_v2 = vshll.u32 %v161_v52, 16  ;;  %v400_v38 = vrot.slane %v398_v28, 5 }
  0x28   : > { %v219_v39 = vsel %vm3978_vm5, %v214_v59, %v218_v46  ;;  %v420_v5 = vrot.slane %v419_v60, 4  ;;  %v429_v6 = vor.u32 %v428_v61, %v424_v57  ;;  %v391_v8 = vrot.slane %v389_v62, 4 }
  0x29   : > { %v3530_v11 = vcombine.low %v209_v63, %v219_v39  ;;  %v394_v14 = vrot.slane %v392_v2, 5  ;;  %v402_v15 = vshrl.u32 %v3906_v12, 16  ;;  %v408_v16 = vshll.u32 %v3912_v17, 16  ;;  %v4013_v12 = vld [vmem:[%s3889_s14 + $0x1c] sm:$0xf] }
  0x2a   : > { %v425_v28 = vsel %vm3978_vm5, %v420_v5, %v424_v57  ;;  %v430_v18 = vrot.slane %v429_v6, 4  ;;  %v1025_v20 = vshrl.u32 %v3372_v4, 16  ;;  %v1028_v22 = vshll.u32 %v3372_v4, 16  ;;  %v4045_v57 = vld [vmem:[%s3889_s14 + $0x80] sm:$0x1] }
  0x2b   : > { %2089 = vrot.lane.b32.xlu0 %v3530_v11, %s3854_s17  ;;  %v395_v24 = vor.u32 %v394_v14, %v391_v8  ;;  %v404_v25 = vrot.slane %v402_v15, 4  ;;  %v410_v26 = vrot.slane %v408_v16, 5  ;;  %v1038_v29 = vshrl.u32 %v4001_v10, 16  ;;  %v3410_v8 = vld [vmem:[%s3889_s14 + $0x6c] sm:$0xe] }
  0x2c   : > { %v435_v17 = vsel %vm3978_vm5, %v430_v18, %v434_v0  ;;  %v1027_v32 = vrot.slane %v1025_v20, 4  ;;  %v1030_v33 = vrot.slane %v1028_v22, 5  ;;  %v3571_v34 = vcombine.low %v3372_v4, %v4001_v10  ;;  %v4054_v0 = vld [vmem:[%s3889_s14 + $0x20] sm:$0x1] }
  0x2d   : > { %v3539_v36 = vcombine.low %v425_v28, %v435_v17  ;;  %v396_v37 = vrot.slane %v395_v24, 4  ;;  %v405_v41 = vor.u32 %v404_v25, %v400_v38  ;;  %v833_v42 = vshrl.u32 %v4008_v23, 16  ;;  %v3402_v28 = vld [vmem:[%s3889_s14 + $0xc] sm:$0xe]  ;;  %v3411_v17 = vld [vmem:[%s3889_s14 + $0x78] sm:$0xe] }
  0x2e   : > { %v836_v43 = vshll.u32 %v4008_v23, 16  ;;  %v846_v44 = vshrl.u32 %v4013_v12, 16  ;;  %v3563_v46 = vcombine.low %v4008_v23, %v4013_v12  ;;  %v1012_v47 = vrot.slane %v1010_v3, 5 }
  0x2f   : > { %2107 = vrot.lane.b32.xlu1 %v3539_v36, %s3854_s17  ;;  %v401_v49 = vsel %vm3978_vm5, %v396_v37, %v400_v38  ;;  %v406_v50 = vrot.slane %v405_v41, 4  ;;  %v835_v51 = vrot.slane %v833_v42, 4  ;;  %v1020_v52 = vshll.u32 %v4019_v35, 16 }
  0x30   : > { %v838_v27 = vrot.slane %v836_v43, 5  ;;  %v1013_v31 = vsel %vm3978_vm5, %v3944_v40, %v1012_v47  ;;  %v1017_v53 = vor.u32 %v3908_v13, %v1012_v47  ;;  %v820_v3 = vrot.slane %v818_v9, 5  ;;  %v3403_v47 = vld [vmem:[%s3889_s14 + $0x18] sm:$0xe] }
  0x31   : > { %v411_v54 = vsel %vm3978_vm5, %v406_v50, %v410_v26  ;;  %v1022_v55 = vrot.slane %v1020_v52, 5  ;;  %v828_v56 = vshll.u32 %v4029_v48, 16  ;;  %v1031_v58 = vor.u32 %v1030_v33, %v1027_v32 }
  0x32   : > { %v3538_v59 = vcombine.low %v401_v49, %v411_v54  ;;  %v1018_v60 = vrot.slane %v1017_v53, 4  ;;  %v821_v40 = vsel %vm3978_vm5, %v3950_v45, %v820_v3  ;;  %v825_v13 = vor.u32 %v3914_v19, %v820_v3  ;;  %v4096_v53 = vld [vmem:[%s3889_s14 + $0x7c] sm:$0xf] }
  0x33   : > { %2283 = vrot.lane.b32.xlu1 %v3571_v34, %s3852_s15  ;;  %v830_v9 = vrot.slane %v828_v56, 5  ;;  %v1032_v61 = vrot.slane %v1031_v58, 4  ;;  %v1034_v62 = vshll.u32 %v4001_v10, 16  ;;  %v1040_v63 = vrot.slane %v1038_v29, 4  ;;  %v4103_v58 = vld [vmem:[%s3889_s14 + $0x18] sm:$0xf] }
  0x34   : > { %2105 = vrot.lane.b32.xlu0 %v3538_v59, %s3854_s17  ;;  %v1023_v2 = vsel %vm3978_vm5, %v1018_v60, %v1022_v55  ;;  %v826_v38 = vrot.slane %v825_v13, 4  ;;  %v1044_v45 = vshll.u32 %v4045_v57, 16  ;;  %v839_v19 = vor.u32 %v838_v27, %v835_v51  ;;  %v4089_v51 = vld [vmem:[%s3889_s14 + $0x78] sm:$0xf] }
  0x35   : > { %v3586_v4 = vcombine.low %v1013_v31, %v1023_v2  ;;  %v1036_v39 = vrot.slane %v1034_v62, 5  ;;  %v842_v5 = vshll.u32 %v4013_v12, 16  ;;  %v848_v6 = vrot.slane %v846_v44, 4 }
  0x36   : > { %v831_v11 = vsel %vm3978_vm5, %v826_v38, %v830_v9  ;;  %v1046_v14 = vrot.slane %v1044_v45, 5  ;;  %v840_v15 = vrot.slane %v839_v19, 4  ;;  %v852_v16 = vshll.u32 %v4054_v0, 16  ;;  %v4109_v9 = vld [vmem:[%s3889_s14 + $0x1c] sm:$0xf] }
  0x37   : > { %2361 = vrot.lane.b32.xlu1 %v3586_v4, %s3855_s18  ;;  %v3578_v18 = vcombine.low %v821_v40, %v831_v11  ;;  %v1037_v20 = vsel %vm3978_vm5, %v1032_v61, %v1036_v39  ;;  %v1041_v22 = vor.u32 %v1040_v63, %v1036_v39  ;;  %v844_v23 = vrot.slane %v842_v5, 5  ;;  %v4124_v19 = vld [vmem:[%s3889_s14 + $0x88] sm:$0xf] }
  0x38   : > { %2267 = vrot.lane.b32.xlu0 %v3563_v46, %s3852_s15  ;;  %v854_v24 = vrot.slane %v852_v16, 5  ;;  %v3426_v25 = vrot.slane %v3410_v8, 9  ;;  %v1314_v26 = vrot.slane %v3893_v1, 5  ;;  %v1317_v29 = vrot.slane %v4019_v35, 5  ;;  %v4131_v8 = vld [vmem:[%s3889_s14 + $0x24] sm:$0xf] }
  0x39   : > { %v1042_v32 = vrot.slane %v1041_v22, 4  ;;  %v845_v33 = vsel %vm3978_vm5, %v840_v15, %v844_v23  ;;  %v849_v34 = vor.u32 %v848_v6, %v844_v23  ;;  %v3418_v36 = vrot.slane %v3402_v28, 9  ;;  %v4140_v28 = vld [vmem:[%s3889_s14 + $0x28] sm:$0xf] }
  0x3a   : > { %v1315_v37 = vsel %vm3920_vm2, %v3426_v25, %v1314_v26  ;;  %v1316_v41 = vrot.slane %v1314_v26, 4  ;;  %v1258_v42 = vrot.slane %v3900_v7, 5  ;;  %v1261_v43 = vrot.slane %v4029_v48, 5 }
  0x3b   : > { %v1047_v1 = vsel %vm3978_vm5, %v1042_v32, %v1046_v14  ;;  %v850_v35 = vrot.slane %v849_v34, 4  ;;  %v3427_v44 = vrot.slane %v3411_v17, 9  ;;  %v1321_v46 = vrot.slane %v4001_v10, 5 }
  0x3c   : > { %2345 = vrot.lane.b32.xlu0 %v3578_v18, %s3855_s18  ;;  %v3587_v49 = vcombine.low %v1037_v20, %v1047_v1  ;;  %v1318_v50 = vsel %vm3920_vm2, %v1316_v41, %v1317_v29  ;;  %v1259_v7 = vsel %vm3920_vm2, %v3418_v36, %v1258_v42  ;;  %v1260_v48 = vrot.slane %v1258_v42, 4 }
  0x3d   : > { %v855_v52 = vsel %vm3978_vm5, %v850_v35, %v854_v24  ;;  %v3602_v27 = vcombine.low %v1315_v37, %v1318_v50  ;;  %v1322_v10 = vsel %vm3920_vm2, %v3427_v44, %v1321_v46  ;;  %v1323_v31 = vrot.slane %v1321_v46, 4  ;;  %v4145_v24 = vld [vmem:[%s3889_s14 + $0x80] sm:$0x1] }
  0x3e   : > { %2363 = vrot.lane.b32.xlu1 %v3587_v49, %s3855_s18  ;;  %v3579_v3 = vcombine.low %v845_v33, %v855_v52  ;;  %v1262_v54 = vsel %vm3920_vm2, %v1260_v48, %v1261_v43  ;;  %v1324_v55 = vrot.slane %v4045_v57, 5  ;;  %v3419_v56 = vrot.slane %v3403_v47, 9  ;;  %v4156_v37 = vld [vmem:[%s3889_s14 + $0x20] sm:$0x1] }
  0x3f   : > { %v3594_v59 = vcombine.low %v1259_v7, %v1262_v54  ;;  %v1265_v60 = vrot.slane %v4013_v12, 5  ;;  %v1268_v40 = vrot.slane %v4054_v0, 5  ;;  %v1610_v13 = vshrl.u32 %v4089_v51, 16  ;;  %v4119_v12 = vld [vmem:[%s3889_s14 + $0x84] sm:$0xf] }
  0x40   : > { %2347 = vrot.lane.b32.xlu0 %v3579_v3, %s3855_s18  ;;  %v1325_v61 = vsel %vm3920_vm2, %v1323_v31, %v1324_v55  ;;  %v1613_v57 = vshll.u32 %v4089_v51, 16  ;;  %v1623_v62 = vshrl.u32 %v4096_v53, 16  ;;  %v3618_v63 = vcombine.low %v4089_v51, %v4096_v53 }
  0x41   : > { %v3603_v0 = vcombine.low %v1322_v10, %v1325_v61  ;;  %v1266_v2 = vsel %vm3920_vm2, %v3419_v56, %v1265_v60  ;;  %v1267_v38 = vrot.slane %v1265_v60, 4  ;;  %v1612_v45 = vrot.slane %v1610_v13, 4 }
  0x42   : > { %2441 = vrot.lane.b32.xlu1 %v3602_v27, %s3856_s19  ;;  %v1615_v4 = vrot.slane %v1613_v57, 5  ;;  %v1418_v39 = vshrl.u32 %v4103_v58, 16  ;;  %v1421_v5 = vshll.u32 %v4103_v58, 16  ;;  %v1431_v6 = vshrl.u32 %v4109_v9, 16  ;;  %v4165_v27 = vld [vmem:[%s3889_s14 + $0x8c] sm:$0x1] }
  0x43   : > { %v1269_v11 = vsel %vm3920_vm2, %v1267_v38, %v1268_v40  ;;  %v3610_v14 = vcombine.low %v4103_v58, %v4109_v9  ;;  %v1634_v15 = vshrl.u32 %v4119_v12, 16  ;;  %v1637_v16 = vshll.u32 %v4119_v12, 16  ;;  %v4175_v57 = vld [vmem:[%s3889_s14 + $0x2c] sm:$0x1] }
  0x44   : > { %2425 = vrot.lane.b32.xlu0 %v3594_v59, %s3856_s19  ;;  %v3595_v18 = vcombine.low %v1266_v2, %v1269_v11  ;;  %v1420_v20 = vrot.slane %v1418_v39, 4  ;;  %v1423_v22 = vrot.slane %v1421_v5, 5  ;;  %v1647_v23 = vshrl.u32 %v4124_v19, 16 }
  0x45   : > { %v1636_v25 = vrot.slane %v1634_v15, 4  ;;  %v1639_v26 = vrot.slane %v1637_v16, 5  ;;  %v3619_v29 = vcombine.low %v4119_v12, %v4124_v19  ;;  %v1442_v17 = vshrl.u32 %v4131_v8, 16  ;;  %v3482_v16 = vld [vmem:[%s3889_s14 + $0x18] sm:$0xe] }
  0x46   : > { %2443 = vrot.lane.b32.xlu1 %v3603_v0, %s3856_s19  ;;  %v1445_v32 = vshll.u32 %v4131_v8, 16  ;;  %v1455_v33 = vshrl.u32 %v4140_v28, 16  ;;  %v3611_v34 = vcombine.low %v4131_v8, %v4140_v28  ;;  %v1616_v36 = vor.u32 %v1615_v4, %v1612_v45  ;;  %v3490_v45 = vld [vmem:[%s3889_s14 + $0x78] sm:$0xe] }
  0x47   : > { %v1444_v41 = vrot.slane %v1442_v17, 4  ;;  %v1619_v42 = vshll.u32 %v4096_v53, 16  ;;  %v1625_v43 = vrot.slane %v1623_v62, 4  ;;  %v1629_v1 = vshll.u32 %v4145_v24, 16 }
  0x48   : > { %2427 = vrot.lane.b32.xlu0 %v3595_v18, %s3856_s19  ;;  %v1447_v35 = vrot.slane %v1445_v32, 5  ;;  %v1617_v44 = vrot.slane %v1616_v36, 4  ;;  %v1424_v46 = vor.u32 %v1423_v22, %v1420_v20  ;;  %v1427_v47 = vshll.u32 %v4109_v9, 16 }
  0x49   : > { %v1621_v49 = vrot.slane %v1619_v42, 5  ;;  %v1631_v50 = vrot.slane %v1629_v1, 5  ;;  %v1433_v7 = vrot.slane %v1431_v6, 4  ;;  %v1437_v48 = vshll.u32 %v4156_v37, 16  ;;  %v4199_v42 = vld [vmem:[%s3889_s14 + $0x7c] sm:$0xf] }
  0x4a   : > { %2537 = vrot.lane.b32.xlu1 %v3618_v63, %s3857_s20  ;;  %v1425_v51 = vrot.slane %v1424_v46, 4  ;;  %v1429_v52 = vrot.slane %v1427_v47, 5  ;;  %v1640_v10 = vor.u32 %v1639_v26, %v1636_v25  ;;  %v1643_v31 = vshll.u32 %v4124_v19, 16  ;;  %v165_v25 = vld [vmem:[%s3889_s14 + $0x78] sm:$0xf] }
  0x4b   : > { %v1622_v3 = vsel %vm3978_vm5, %v1617_v44, %v1621_v49  ;;  %v1626_v54 = vor.u32 %v1625_v43, %v1621_v49  ;;  %v1439_v55 = vrot.slane %v1437_v48, 5  ;;  %v1649_v56 = vrot.slane %v1647_v23, 4  ;;  %v4210_v46 = vld [vmem:[%s3889_s14 + $0x80] sm:$0x1]  ;;  %v149_v49 = vld [vmem:[%s3889_s14 + $0x18] sm:$0xf] }
  0x4c   : > { %2521 = vrot.lane.b32.xlu0 %v3610_v14, %s3857_s20  ;;  %v1430_v58 = vsel %vm3978_vm5, %v1425_v51, %v1429_v52  ;;  %v1434_v59 = vor.u32 %v1433_v7, %v1429_v52  ;;  %v1641_v60 = vrot.slane %v1640_v10, 4  ;;  %v1645_v40 = vrot.slane %v1643_v31, 5  ;;  %v4218_v51 = vld [vmem:[%s3889_s14 + $0x1c] sm:$0xf] }
  0x4d   : > { %v1627_v13 = vrot.slane %v1626_v54, 4  ;;  %v1653_v61 = vshll.u32 %v4165_v27, 16  ;;  %v1448_v62 = vor.u32 %v1447_v35, %v1444_v41  ;;  %v1451_v63 = vshll.u32 %v4140_v28, 16  ;;  %v4224_v54 = vld [vmem:[%s3889_s14 + $0x20] sm:$0x1] }
  0x4e   : > { %2539 = vrot.lane.b32.xlu1 %v3619_v29, %s3857_s20  ;;  %v1435_v12 = vrot.slane %v1434_v59, 4  ;;  %v1646_v0 = vsel %vm3978_vm5, %v1641_v60, %v1645_v40  ;;  %v1650_v2 = vor.u32 %v1649_v56, %v1645_v40  ;;  %v1457_v38 = vrot.slane %v1455_v33, 4 }
  0x4f   : > { %v1632_v4 = vsel %vm3978_vm5, %v1627_v13, %v1631_v50  ;;  %v1655_v39 = vrot.slane %v1653_v61, 5  ;;  %v1449_v5 = vrot.slane %v1448_v62, 4  ;;  %v1453_v6 = vrot.slane %v1451_v63, 5  ;;  %v3491_v62 = vld [vmem:[%s3889_s14 + $0x84] sm:$0xe] }
  0x50   : > { %2523 = vrot.lane.b32.xlu0 %v3611_v34, %s3857_s20  ;;  %v3634_v8 = vcombine.low %v1622_v3, %v1632_v4  ;;  %v1440_v11 = vsel %vm3978_vm5, %v1435_v12, %v1439_v55  ;;  %v1651_v14 = vrot.slane %v1650_v2, 4  ;;  %v1461_v15 = vshll.u32 %v4175_v57, 16 }
  0x51   : > { %v3626_v18 = vcombine.low %v1430_v58, %v1440_v11  ;;  %v1454_v20 = vsel %vm3978_vm5, %v1449_v5, %v1453_v6  ;;  %v1458_v22 = vor.u32 %v1457_v38, %v1453_v6  ;;  %v3506_v23 = vrot.slane %v3490_v45, 9  ;;  %v3483_v5 = vld [vmem:[%s3889_s14 + $0x24] sm:$0xe] }
  0x52   : > { %2617 = vrot.lane.b32.xlu1 %v3634_v8, %s3858_s21  ;;  %v1656_v26 = vsel %vm3978_vm5, %v1651_v14, %v1655_v39  ;;  %v1463_v29 = vrot.slane %v1461_v15, 5  ;;  %v1923_v17 = vrot.slane %v4096_v53, 5  ;;  %v1926_v32 = vrot.slane %v4145_v24, 5 }
  0x53   : > { %v3635_v33 = vcombine.low %v1646_v0, %v1656_v26  ;;  %v1459_v34 = vrot.slane %v1458_v22, 4  ;;  %v3498_v36 = vrot.slane %v3482_v16, 9  ;;  %v1867_v41 = vrot.slane %v4109_v9, 5  ;;  %v167_v22 = vld [vmem:[%s3889_s14 + $0x84] sm:$0xf] }
  0x54   : > { %2601 = vrot.lane.b32.xlu0 %v3626_v18, %s3858_s21  ;;  %v1924_v43 = vsel %vm3920_vm2, %v3506_v23, %v1923_v17  ;;  %v1925_v1 = vrot.slane %v1923_v17, 4  ;;  %v1870_v35 = vrot.slane %v4156_v37, 5  ;;  %v437_v53 = vshrl.u32 %v165_v25, 16 }
  0x55   : > { %v1464_v24 = vsel %vm3978_vm5, %v1459_v34, %v1463_v29  ;;  %v1868_v44 = vsel %vm3920_vm2, %v3498_v36, %v1867_v41  ;;  %v1869_v9 = vrot.slane %v1867_v41, 4  ;;  %v440_v47 = vshll.u32 %v165_v25, 16  ;;  %v4247_v34 = vld [vmem:[%s3889_s14 + $0x88] sm:$0xf] }
  0x56   : > { %2619 = vrot.lane.b32.xlu1 %v3635_v33, %s3858_s21  ;;  %v3627_v50 = vcombine.low %v1454_v20, %v1464_v24  ;;  %v1927_v7 = vsel %vm3920_vm2, %v1925_v1, %v1926_v32  ;;  %v439_v37 = vrot.slane %v437_v53, 4  ;;  %v446_v48 = vshll.u32 %v4199_v42, 16  ;;  %v151_v24 = vld [vmem:[%s3889_s14 + $0x24] sm:$0xf] }
  0x57   : > { %v3650_v52 = vcombine.low %v1924_v43, %v1927_v7  ;;  %v1871_v10 = vsel %vm3920_vm2, %v1869_v9, %v1870_v35  ;;  %v442_v31 = vrot.slane %v440_v47, 5  ;;  %v450_v3 = vshrl.u32 %v4199_v42, 16  ;;  %v4252_v43 = vld [vmem:[%s3889_s14 + $0x8c] sm:$0x1] }
  0x58   : > { %2603 = vrot.lane.b32.xlu0 %v3627_v50, %s3858_s21  ;;  %v3642_v55 = vcombine.low %v1868_v44, %v1871_v10  ;;  %v448_v56 = vrot.slane %v446_v48, 5  ;;  %v456_v58 = vshll.u32 %v4210_v46, 16  ;;  %v245_v59 = vshrl.u32 %v149_v49, 16  ;;  %v4264_v50 = vld [vmem:[%s3889_s14 + $0x28] sm:$0xf] }
  0x59   : > { %v443_v60 = vor.u32 %v442_v31, %v439_v37  ;;  %v452_v40 = vrot.slane %v450_v3, 4  ;;  %v248_v13 = vshll.u32 %v149_v49, 16  ;;  %v254_v61 = vshll.u32 %v4218_v51, 16  ;;  %v4271_v10 = vld [vmem:[%s3889_s14 + $0x2c] sm:$0x1] }
  0x5a   : > { %2697 = vrot.lane.b32.xlu1 %v3650_v52, %s3859_s22  ;;  %v458_v63 = vrot.slane %v456_v58, 5  ;;  %v247_v12 = vrot.slane %v245_v59, 4  ;;  %v258_v0 = vshrl.u32 %v4218_v51, 16  ;;  %v264_v2 = vshll.u32 %v4224_v54, 16  ;;  %v590_v58 = vld [vmem:[%s3889_s14 + $0x78] sm:$0xe] }
  0x5b   : > { %v444_v38 = vrot.slane %v443_v60, 4  ;;  %v453_v45 = vor.u32 %v452_v40, %v448_v56  ;;  %v250_v4 = vrot.slane %v248_v13, 5  ;;  %v256_v39 = vrot.slane %v254_v61, 5 }
  0x5c   : > { %2681 = vrot.lane.b32.xlu0 %v3642_v55, %s3859_s22  ;;  %v260_v6 = vrot.slane %v258_v0, 4  ;;  %v266_v8 = vrot.slane %v264_v2, 5  ;;  %v3507_v11 = vrot.slane %v3491_v62, 9  ;;  %v1930_v14 = vrot.slane %v4124_v19, 5  ;;  %v582_v0 = vld [vmem:[%s3889_s14 + $0x18] sm:$0xe] }
  0x5d   : > { %v449_v15 = vsel %vm3978_vm5, %v444_v38, %v448_v56  ;;  %v454_v16 = vrot.slane %v453_v45, 4  ;;  %v251_v18 = vor.u32 %v250_v4, %v247_v12  ;;  %v1933_v20 = vrot.slane %v4165_v27, 5 }
  0x5e   : > { %v261_v23 = vor.u32 %v260_v6, %v256_v39  ;;  %v1931_v25 = vsel %vm3920_vm2, %v3507_v11, %v1930_v14  ;;  %v1932_v26 = vrot.slane %v1930_v14, 4  ;;  %v3499_v29 = vrot.slane %v3483_v5, 9 }
  0x5f   : > { %v459_v17 = vsel %vm3978_vm5, %v454_v16, %v458_v63  ;;  %v252_v19 = vrot.slane %v251_v18, 4  ;;  %v1874_v32 = vrot.slane %v4140_v28, 5  ;;  %v1877_v33 = vrot.slane %v4175_v57, 5  ;;  %v591_v18 = vld [vmem:[%s3889_s14 + $0x84] sm:$0xe] }
  0x60   : > { %v3540_v27 = vcombine.low %v449_v15, %v459_v17  ;;  %v262_v36 = vrot.slane %v261_v23, 4  ;;  %v1934_v41 = vsel %vm3920_vm2, %v1932_v26, %v1933_v20  ;;  %v461_v1 = vshrl.u32 %v167_v22, 16 }
  0x61   : > { %v257_v35 = vsel %vm3978_vm5, %v252_v19, %v256_v39  ;;  %v3651_v53 = vcombine.low %v1931_v25, %v1934_v41  ;;  %v1875_v28 = vsel %vm3920_vm2, %v3499_v29, %v1874_v32  ;;  %v1876_v57 = vrot.slane %v1874_v32, 4 }
  0x62   : > { %2109 = vrot.lane.b32.xlu1 %v3540_v27, %s3854_s17  ;;  %v267_v44 = vsel %vm3978_vm5, %v262_v36, %v266_v8  ;;  %v463_v9 = vrot.slane %v461_v1, 4  ;;  %v464_v47 = vshll.u32 %v167_v22, 16  ;;  %v470_v49 = vshll.u32 %v4247_v34, 16 }
  0x63   : > { %v3532_v7 = vcombine.low %v257_v35, %v267_v44  ;;  %v1878_v37 = vsel %vm3920_vm2, %v1876_v57, %v1877_v33  ;;  %v474_v48 = vshrl.u32 %v4247_v34, 16  ;;  %v480_v52 = vshll.u32 %v4252_v43, 16 }
  0x64   : > { %v3643_v31 = vcombine.low %v1875_v28, %v1878_v37  ;;  %v466_v3 = vrot.slane %v464_v47, 5  ;;  %v472_v55 = vrot.slane %v470_v49, 5  ;;  %v269_v56 = vshrl.u32 %v151_v24, 16 }
  0x65   : > { %2093 = vrot.lane.b32.xlu0 %v3532_v7, %s3854_s17  ;;  %v476_v59 = vrot.slane %v474_v48, 4  ;;  %v482_v60 = vrot.slane %v480_v52, 5  ;;  %v272_v40 = vshll.u32 %v151_v24, 16  ;;  %v278_v13 = vshll.u32 %v4264_v50, 16  ;;  %v4308_v24 = vld [vmem:[%s3889_s14 + $0x88] sm:$0xf] }
  0x66   : > { %2699 = vrot.lane.b32.xlu1 %v3651_v53, %s3859_s22  ;;  %v467_v61 = vor.u32 %v466_v3, %v463_v9  ;;  %v271_v62 = vrot.slane %v269_v56, 4  ;;  %v282_v63 = vshrl.u32 %v4264_v50, 16  ;;  %v288_v12 = vshll.u32 %v4271_v10, 16  ;;  %v4315_v7 = vld [vmem:[%s3889_s14 + $0x24] sm:$0xf] }
  0x67   : > { %v477_v2 = vor.u32 %v476_v59, %v472_v55  ;;  %v274_v38 = vrot.slane %v272_v40, 5  ;;  %v280_v45 = vrot.slane %v278_v13, 5  ;;  %v3348_v4 = vrot.slane %v590_v58, 9  ;;  %v4326_v3 = vld [vmem:[%s3889_s14 + $0x28] sm:$0xf] }
  0x68   : > { %v468_v39 = vrot.slane %v467_v61, 4  ;;  %v284_v5 = vrot.slane %v282_v63, 4  ;;  %v290_v6 = vrot.slane %v288_v12, 5  ;;  %v719_v8 = vrot.slane %v4199_v42, 5  ;;  %v4336_v40 = vld [vmem:[%s3889_s14 + $0x94] sm:$0xf] }
  0x69   : > { %2683 = vrot.lane.b32.xlu0 %v3643_v31, %s3859_s22  ;;  %v478_v11 = vrot.slane %v477_v2, 4  ;;  %v275_v14 = vor.u32 %v274_v38, %v271_v62  ;;  %v722_v15 = vrot.slane %v4210_v46, 5  ;;  %v3340_v16 = vrot.slane %v582_v0, 9  ;;  %v583_v46 = vld [vmem:[%s3889_s14 + $0x24] sm:$0xe] }
  0x6a   : > { %v473_v20 = vsel %vm3978_vm5, %v468_v39, %v472_v55  ;;  %v285_v22 = vor.u32 %v284_v5, %v280_v45  ;;  %v720_v23 = vsel %vm3920_vm2, %v3348_v4, %v719_v8  ;;  %v721_v25 = vrot.slane %v719_v8, 4  ;;  %v4342_v12 = vld [vmem:[%s3889_s14 + $0x30] sm:$0xf]  ;;  %v4345_v0 = vld [vmem:[%s3889_s14 + $0x34] sm:$0xf] }
  0x6b   : > { %v483_v42 = vsel %vm3978_vm5, %v478_v11, %v482_v60  ;;  %v276_v26 = vrot.slane %v275_v14, 4  ;;  %v663_v29 = vrot.slane %v4218_v51, 5  ;;  %v666_v17 = vrot.slane %v4224_v54, 5  ;;  %v4300_v51 = vld [vmem:[%s3889_s14 + $0x84] sm:$0xf] }
  0x6c   : > { %v3541_v19 = vcombine.low %v473_v20, %v483_v42  ;;  %v286_v32 = vrot.slane %v285_v22, 4  ;;  %v723_v33 = vsel %vm3920_vm2, %v721_v25, %v722_v15  ;;  %v3349_v27 = vrot.slane %v591_v18, 9  ;;  %v3376_v60 = vld [vmem:[%s3889_s14 + $0x90] sm:$0xf]  ;;  %v4358_v18 = vld [vmem:[%s3889_s14 + $0x8c] sm:$0x1] }
  0x6d   : > { %v281_v36 = vsel %vm3978_vm5, %v276_v26, %v280_v45  ;;  %v3556_v41 = vcombine.low %v720_v23, %v723_v33  ;;  %v664_v1 = vsel %vm3920_vm2, %v3340_v16, %v663_v29  ;;  %v665_v35 = vrot.slane %v663_v29, 4  ;;  %v4363_v42 = vld [vmem:[%s3889_s14 + $0x2c] sm:$0x1] }
  0x6e   : > { %2111 = vrot.lane.b32.xlu1 %v3541_v19, %s3854_s17  ;;  %v291_v54 = vsel %vm3978_vm5, %v286_v32, %v290_v6  ;;  %v726_v53 = vrot.slane %v4247_v34, 5  ;;  %v729_v28 = vrot.slane %v4252_v43, 5  ;;  %v3341_v57 = vrot.slane %v583_v46, 9 }
  0x6f   : > { %v3533_v44 = vcombine.low %v281_v36, %v291_v54  ;;  %v667_v9 = vsel %vm3920_vm2, %v665_v35, %v666_v17  ;;  %v670_v47 = vrot.slane %v4264_v50, 5  ;;  %v673_v49 = vrot.slane %v4271_v10, 5 }
  0x70   : > { %v3548_v37 = vcombine.low %v664_v1, %v667_v9  ;;  %v727_v34 = vsel %vm3920_vm2, %v3349_v27, %v726_v53  ;;  %v728_v43 = vrot.slane %v726_v53, 4  ;;  %v1049_v48 = vshrl.u32 %v4300_v51, 16 }
  0x71   : > { %2095 = vrot.lane.b32.xlu0 %v3533_v44, %s3854_s17  ;;  %v671_v52 = vsel %vm3920_vm2, %v3341_v57, %v670_v47  ;;  %v672_v50 = vrot.slane %v670_v47, 4  ;;  %v1052_v10 = vshll.u32 %v4300_v51, 16  ;;  %v1062_v31 = vshrl.u32 %v4308_v24, 16 }
  0x72   : > { %2189 = vrot.lane.b32.xlu1 %v3556_v41, %s3853_s16  ;;  %v730_v55 = vsel %vm3920_vm2, %v728_v43, %v729_v28  ;;  %v1051_v56 = vrot.slane %v1049_v48, 4  ;;  %v3572_v58 = vcombine.low %v4300_v51, %v4308_v24  ;;  %v857_v59 = vshrl.u32 %v4315_v7, 16  ;;  %v4372_v28 = vld [vmem:[%s3889_s14 + $0x98] sm:$0x1] }
  0x73   : > { %v3557_v13 = vcombine.low %v727_v34, %v730_v55  ;;  %v674_v61 = vsel %vm3920_vm2, %v672_v50, %v673_v49  ;;  %v1054_v62 = vrot.slane %v1052_v10, 5  ;;  %v860_v63 = vshll.u32 %v4315_v7, 16  ;;  %v4383_v50 = vld [vmem:[%s3889_s14 + $0x38] sm:$0x1] }
  0x74   : > { %v3549_v2 = vcombine.low %v671_v52, %v674_v61  ;;  %v859_v38 = vrot.slane %v857_v59, 4  ;;  %v870_v45 = vshrl.u32 %v4326_v3, 16  ;;  %v3564_v4 = vcombine.low %v4315_v7, %v4326_v3 }
  0x75   : > { %2173 = vrot.lane.b32.xlu0 %v3548_v37, %s3853_s16  ;;  %v862_v39 = vrot.slane %v860_v63, 5  ;;  %v1073_v5 = vshrl.u32 %v3376_v60, 16  ;;  %v1076_v6 = vshll.u32 %v3376_v60, 16  ;;  %v1086_v8 = vshrl.u32 %v4336_v40, 16 }
  0x76   : > { %2191 = vrot.lane.b32.xlu1 %v3557_v13, %s3853_s16  ;;  %v3573_v11 = vcombine.low %v3376_v60, %v4336_v40  ;;  %v881_v14 = vshrl.u32 %v4342_v12, 16  ;;  %v884_v15 = vshll.u32 %v4342_v12, 16  ;;  %v894_v16 = vshrl.u32 %v4345_v0, 16  ;;  %v3412_v60 = vld [vmem:[%s3889_s14 + $0x84] sm:$0xe] }
  0x77   : > { %v1075_v20 = vrot.slane %v1073_v5, 4  ;;  %v1078_v22 = vrot.slane %v1076_v6, 5  ;;  %v3565_v23 = vcombine.low %v4342_v12, %v4345_v0  ;;  %v1055_v25 = vor.u32 %v1054_v62, %v1051_v56 }
  0x78   : > { %v883_v26 = vrot.slane %v881_v14, 4  ;;  %v886_v29 = vrot.slane %v884_v15, 5  ;;  %v1058_v17 = vshll.u32 %v4308_v24, 16  ;;  %v1064_v46 = vrot.slane %v1062_v31, 4 }
  0x79   : > { %2175 = vrot.lane.b32.xlu0 %v3549_v2, %s3853_s16  ;;  %v1056_v19 = vrot.slane %v1055_v25, 4  ;;  %v1068_v32 = vshll.u32 %v4358_v18, 16  ;;  %v863_v33 = vor.u32 %v862_v39, %v859_v38  ;;  %v866_v27 = vshll.u32 %v4326_v3, 16 }
  0x7a   : > { %2285 = vrot.lane.b32.xlu1 %v3572_v58, %s3852_s15  ;;  %v1060_v36 = vrot.slane %v1058_v17, 5  ;;  %v872_v41 = vrot.slane %v870_v45, 4  ;;  %v876_v1 = vshll.u32 %v4363_v42, 16  ;;  %v1079_v35 = vor.u32 %v1078_v22, %v1075_v20 }
  0x7b   : > { %v1070_v51 = vrot.slane %v1068_v32, 5  ;;  %v864_v54 = vrot.slane %v863_v33, 4  ;;  %v868_v53 = vrot.slane %v866_v27, 5  ;;  %v1082_v57 = vshll.u32 %v4336_v40, 16  ;;  %v4416_v27 = vld [vmem:[%s3889_s14 + $0x90] sm:$0xf] }
  0x7c   : > { %v1061_v44 = vsel %vm3978_vm5, %v1056_v19, %v1060_v36  ;;  %v1065_v9 = vor.u32 %v1064_v46, %v1060_v36  ;;  %v878_v47 = vrot.slane %v876_v1, 5  ;;  %v1080_v49 = vrot.slane %v1079_v35, 4  ;;  %v4423_v35 = vld [vmem:[%s3889_s14 + $0x94] sm:$0xf] }
  0x7d   : > { %2269 = vrot.lane.b32.xlu0 %v3564_v4, %s3852_s15  ;;  %v869_v7 = vsel %vm3978_vm5, %v864_v54, %v868_v53  ;;  %v873_v37 = vor.u32 %v872_v41, %v868_v53  ;;  %v1084_v34 = vrot.slane %v1082_v57, 5  ;;  %v1088_v43 = vrot.slane %v1086_v8, 4  ;;  %v3404_v4 = vld [vmem:[%s3889_s14 + $0x24] sm:$0xe]  ;;  %v4430_v57 = vld [vmem:[%s3889_s14 + $0x30] sm:$0xf] }
  0x7e   : > { %2287 = vrot.lane.b32.xlu1 %v3573_v11, %s3852_s15  ;;  %v1066_v48 = vrot.slane %v1065_v9, 4  ;;  %v1092_v52 = vshll.u32 %v4372_v28, 16  ;;  %v887_v10 = vor.u32 %v886_v29, %v883_v26  ;;  %v890_v31 = vshll.u32 %v4345_v0, 16  ;;  %v3413_v11 = vld [vmem:[%s3889_s14 + $0x90] sm:$0xe] }
  0x7f   : > { %v874_v55 = vrot.slane %v873_v37, 4  ;;  %v1085_v56 = vsel %vm3978_vm5, %v1080_v49, %v1084_v34  ;;  %v1089_v58 = vor.u32 %v1088_v43, %v1084_v34  ;;  %v896_v59 = vrot.slane %v894_v16, 4  ;;  %v3405_v29 = vld [vmem:[%s3889_s14 + $0x30] sm:$0xe]  ;;  %v4437_v49 = vld [vmem:[%s3889_s14 + $0x34] sm:$0xf] }
  0x80   : > { %v1071_v13 = vsel %vm3978_vm5, %v1066_v48, %v1070_v51  ;;  %v1094_v61 = vrot.slane %v1092_v52, 5  ;;  %v888_v62 = vrot.slane %v887_v10, 4  ;;  %v892_v63 = vrot.slane %v890_v31, 5 }
  0x81   : > { %2271 = vrot.lane.b32.xlu0 %v3565_v23, %s3852_s15  ;;  %v3588_v12 = vcombine.low %v1061_v44, %v1071_v13  ;;  %v879_v2 = vsel %vm3978_vm5, %v874_v55, %v878_v47  ;;  %v1090_v38 = vrot.slane %v1089_v58, 4  ;;  %v900_v45 = vshll.u32 %v4383_v50, 16  ;;  %v4454_v55 = vld [vmem:[%s3889_s14 + $0xa0] sm:$0xf]  ;;  %v4460_v13 = vld [vmem:[%s3889_s14 + $0x3c] sm:$0xf] }
  0x82   : > { %v3580_v39 = vcombine.low %v869_v7, %v879_v2  ;;  %v893_v5 = vsel %vm3978_vm5, %v888_v62, %v892_v63  ;;  %v897_v6 = vor.u32 %v896_v59, %v892_v63  ;;  %v3428_v8 = vrot.slane %v3412_v60, 9  ;;  %v4470_v2 = vld [vmem:[%s3889_s14 + $0x40] sm:$0xf] }
  0x83   : > { %2365 = vrot.lane.b32.xlu1 %v3588_v12, %s3855_s18  ;;  %v1095_v14 = vsel %vm3978_vm5, %v1090_v38, %v1094_v61  ;;  %v902_v15 = vrot.slane %v900_v45, 5  ;;  %v1328_v16 = vrot.slane %v4308_v24, 5  ;;  %v1331_v20 = vrot.slane %v4358_v18, 5 }
  0x84   : > { %v3589_v22 = vcombine.low %v1085_v56, %v1095_v14  ;;  %v898_v23 = vrot.slane %v897_v6, 4  ;;  %v3420_v25 = vrot.slane %v3404_v4, 9  ;;  %v1272_v26 = vrot.slane %v4326_v3, 5  ;;  %v4439_v7 = vpop.permute.xlu1 %2281 }
  0x85   : > { %2349 = vrot.lane.b32.xlu0 %v3580_v39, %s3855_s18  ;;  %v1329_v17 = vsel %vm3920_vm2, %v3428_v8, %v1328_v16  ;;  %v1330_v46 = vrot.slane %v1328_v16, 4  ;;  %v1275_v19 = vrot.slane %v4363_v42, 5  ;;  %v3429_v32 = vrot.slane %v3413_v11, 9 }
  0x86   : > { %v903_v24 = vsel %vm3978_vm5, %v898_v23, %v902_v15  ;;  %v1273_v18 = vsel %vm3920_vm2, %v3420_v25, %v1272_v26  ;;  %v1274_v33 = vrot.slane %v1272_v26, 4  ;;  %v1335_v3 = vrot.slane %v4336_v40, 5  ;;  %v4476_v6 = vpop.permute.xlu0 %2265  ;;  %v4489_v26 = vld [vmem:[%s3889_s14 + $0x38] sm:$0x1] }
  0x87   : > { %2367 = vrot.lane.b32.xlu1 %v3589_v22, %s3855_s18  ;;  %v3581_v36 = vcombine.low %v893_v5, %v903_v24  ;;  %v1332_v42 = vsel %vm3920_vm2, %v1330_v46, %v1331_v20  ;;  %v1338_v41 = vrot.slane %v4372_v28, 5  ;;  %v3421_v1 = vrot.slane %v3405_v29, 9  ;;  %v4474_v5 = vld [vmem:[%s3889_s14 + $0x98] sm:$0x1] }
  0x88   : > { %v3604_v51 = vcombine.low %v1329_v17, %v1332_v42  ;;  %v1276_v54 = vsel %vm3920_vm2, %v1274_v33, %v1275_v19  ;;  %v1336_v40 = vsel %vm3920_vm2, %v3429_v32, %v1335_v3  ;;  %v1337_v53 = vrot.slane %v1335_v3, 4 }
  0x89   : > { %2351 = vrot.lane.b32.xlu0 %v3581_v36, %s3855_s18  ;;  %v3596_v44 = vcombine.low %v1273_v18, %v1276_v54  ;;  %v1279_v28 = vrot.slane %v4345_v0, 5  ;;  %v1282_v9 = vrot.slane %v4383_v50, 5  ;;  %v1658_v47 = vshrl.u32 %v4416_v27, 16  ;;  %v4448_v0 = vld [vmem:[%s3889_s14 + $0x9c] sm:$0xf] }
  0x8a   : > { %v1339_v37 = vsel %vm3920_vm2, %v1337_v53, %v1338_v41  ;;  %v1661_v34 = vshll.u32 %v4416_v27, 16  ;;  %v1671_v43 = vshrl.u32 %v4423_v35, 16  ;;  %v3620_v48 = vcombine.low %v4416_v27, %v4423_v35 }
  0x8b   : > { %2445 = vrot.lane.b32.xlu1 %v3604_v51, %s3856_s19  ;;  %v3605_v52 = vcombine.low %v1336_v40, %v1339_v37  ;;  %v1280_v50 = vsel %vm3920_vm2, %v3421_v1, %v1279_v28  ;;  %v1281_v10 = vrot.slane %v1279_v28, 4  ;;  %v1660_v31 = vrot.slane %v1658_v47, 4  ;;  %v4498_v51 = vld [vmem:[%s3889_s14 + $0xa4] sm:$0x1] }
  0x8c   : > { %v1663_v56 = vrot.slane %v1661_v34, 5  ;;  %v1466_v58 = vshrl.u32 %v4430_v57, 16  ;;  %v1469_v59 = vshll.u32 %v4430_v57, 16  ;;  %v1479_v60 = vshrl.u32 %v4437_v49, 16  ;;  %v4482_v16 = vpop.permute.xlu1 %2185 }
  0x8d   : > { %2429 = vrot.lane.b32.xlu0 %v3596_v44, %s3856_s19  ;;  %v1283_v61 = vsel %vm3920_vm2, %v1281_v10, %v1282_v9  ;;  %v3612_v62 = vcombine.low %v4430_v57, %v4437_v49  ;;  %v1682_v63 = vshrl.u32 %v4448_v0, 16  ;;  %v1685_v12 = vshll.u32 %v4448_v0, 16 }
  0x8e   : > { %v3597_v38 = vcombine.low %v1280_v50, %v1283_v61  ;;  %v1468_v45 = vrot.slane %v1466_v58, 4  ;;  %v1471_v4 = vrot.slane %v1469_v59, 5  ;;  %v1695_v39 = vshrl.u32 %v4454_v55, 16  ;;  %v4501_v53 = vpop.permute.xlu0 %2169  ;;  %v4513_v50 = vld [vmem:[%s3889_s14 + $0x44] sm:$0x1] }
  0x8f   : > { %2447 = vrot.lane.b32.xlu1 %v3605_v52, %s3856_s19  ;;  %v1684_v8 = vrot.slane %v1682_v63, 4  ;;  %v1687_v11 = vrot.slane %v1685_v12, 5  ;;  %v3621_v14 = vcombine.low %v4448_v0, %v4454_v55  ;;  %v1490_v15 = vshrl.u32 %v4460_v13, 16 }
  0x90   : > { %v1493_v20 = vshll.u32 %v4460_v13, 16  ;;  %v1503_v22 = vshrl.u32 %v4470_v2, 16  ;;  %v3613_v23 = vcombine.low %v4460_v13, %v4470_v2  ;;  %v1664_v25 = vor.u32 %v1663_v56, %v1660_v31  ;;  %v4506_v47 = vpop.permute.xlu1 %2187  ;;  %v3492_v13 = vld [vmem:[%s3889_s14 + $0x90] sm:$0xe] }
  0x91   : > { %2431 = vrot.lane.b32.xlu0 %v3597_v38, %s3856_s19  ;;  %v1492_v29 = vrot.slane %v1490_v15, 4  ;;  %v1667_v17 = vshll.u32 %v4423_v35, 16  ;;  %v1673_v46 = vrot.slane %v1671_v43, 4  ;;  %v1677_v19 = vshll.u32 %v4474_v5, 16 }
  0x92   : > { %v1495_v32 = vrot.slane %v1493_v20, 5  ;;  %v1665_v24 = vrot.slane %v1664_v25, 4  ;;  %v1472_v18 = vor.u32 %v1471_v4, %v1468_v45  ;;  %v1475_v33 = vshll.u32 %v4437_v49, 16 }
  0x93   : > { %2541 = vrot.lane.b32.xlu1 %v3620_v48, %s3857_s20  ;;  %v1669_v3 = vrot.slane %v1667_v17, 5  ;;  %v1679_v27 = vrot.slane %v1677_v19, 5  ;;  %v1481_v36 = vrot.slane %v1479_v60, 4  ;;  %v1485_v42 = vshll.u32 %v4489_v26, 16 }
  0x94   : > { %v1473_v41 = vrot.slane %v1472_v18, 4  ;;  %v1477_v1 = vrot.slane %v1475_v33, 5  ;;  %v1688_v54 = vor.u32 %v1687_v11, %v1684_v8  ;;  %v1691_v40 = vshll.u32 %v4454_v55, 16  ;;  %v3484_v8 = vld [vmem:[%s3889_s14 + $0x30] sm:$0xe]  ;;  %v4526_v11 = vpop.permute.xlu0 %2171 }
  0x95   : > { %2525 = vrot.lane.b32.xlu0 %v3612_v62, %s3857_s20  ;;  %v1670_v57 = vsel %vm3978_vm5, %v1665_v24, %v1669_v3  ;;  %v1674_v44 = vor.u32 %v1673_v46, %v1669_v3  ;;  %v1487_v28 = vrot.slane %v1485_v42, 5  ;;  %v1697_v9 = vrot.slane %v1695_v39, 4  ;;  %v4541_v3 = vld [vmem:[%s3889_s14 + $0x94] sm:$0xf] }
  0x96   : > { %v1478_v37 = vsel %vm3978_vm5, %v1473_v41, %v1477_v1  ;;  %v1482_v34 = vor.u32 %v1481_v36, %v1477_v1  ;;  %v1689_v43 = vrot.slane %v1688_v54, 4  ;;  %v1693_v48 = vrot.slane %v1691_v40, 5  ;;  %v4551_v54 = vld [vmem:[%s3889_s14 + $0x98] sm:$0x1]  ;;  %v153_v40 = vld [vmem:[%s3889_s14 + $0x30] sm:$0xf] }
  0x97   : > { %2543 = vrot.lane.b32.xlu1 %v3621_v14, %s3857_s20  ;;  %v1675_v0 = vrot.slane %v1674_v44, 4  ;;  %v1701_v52 = vshll.u32 %v4498_v51, 16  ;;  %v1496_v10 = vor.u32 %v1495_v32, %v1492_v29  ;;  %v1499_v31 = vshll.u32 %v4470_v2, 16 }
  0x98   : > { %v1483_v56 = vrot.slane %v1482_v34, 4  ;;  %v1694_v58 = vsel %vm3978_vm5, %v1689_v43, %v1693_v48  ;;  %v1698_v59 = vor.u32 %v1697_v9, %v1693_v48  ;;  %v1505_v60 = vrot.slane %v1503_v22, 4  ;;  %v4559_v9 = vld [vmem:[%s3889_s14 + $0x34] sm:$0xf] }
  0x99   : > { %2527 = vrot.lane.b32.xlu0 %v3613_v23, %s3857_s20  ;;  %v1680_v61 = vsel %vm3978_vm5, %v1675_v0, %v1679_v27  ;;  %v1703_v62 = vrot.slane %v1701_v52, 5  ;;  %v1497_v63 = vrot.slane %v1496_v10, 4  ;;  %v1501_v12 = vrot.slane %v1499_v31, 5  ;;  %v169_v23 = vld [vmem:[%s3889_s14 + $0x90] sm:$0xf]  ;;  %v4531_v25 = vpop.permute.xlu1 %2091 }
  0x9a   : > { %v3636_v38 = vcombine.low %v1670_v57, %v1680_v61  ;;  %v1488_v45 = vsel %vm3978_vm5, %v1483_v56, %v1487_v28  ;;  %v1699_v4 = vrot.slane %v1698_v59, 4  ;;  %v1509_v39 = vshll.u32 %v4513_v50, 16  ;;  %v4567_v52 = vld [vmem:[%s3889_s14 + $0x38] sm:$0x1] }
  0x9b   : > { %v3628_v14 = vcombine.low %v1478_v37, %v1488_v45  ;;  %v1502_v15 = vsel %vm3978_vm5, %v1497_v63, %v1501_v12  ;;  %v1506_v20 = vor.u32 %v1505_v60, %v1501_v12  ;;  %v3508_v22 = vrot.slane %v3492_v13, 9 }
  0x9c   : > { %2621 = vrot.lane.b32.xlu1 %v3636_v38, %s3858_s21  ;;  %v1704_v29 = vsel %vm3978_vm5, %v1699_v4, %v1703_v62  ;;  %v1511_v17 = vrot.slane %v1509_v39, 5  ;;  %v1937_v46 = vrot.slane %v4423_v35, 5  ;;  %v1940_v19 = vrot.slane %v4474_v5, 5 }
  0x9d   : > { %2605 = vrot.lane.b32.xlu0 %v3628_v14, %s3858_s21  ;;  %v3637_v32 = vcombine.low %v1694_v58, %v1704_v29  ;;  %v1507_v24 = vrot.slane %v1506_v20, 4  ;;  %v3500_v18 = vrot.slane %v3484_v8, 9  ;;  %v1881_v33 = vrot.slane %v4437_v49, 5  ;;  %v4561_v37 = vpop.permute.xlu0 %2089  ;;  %v3814_v29 = vld [vmem:[%s3889_s14 + $0xc] sm:$0xf] }
  0x9e   : > { %v1938_v27 = vsel %vm3920_vm2, %v3508_v22, %v1937_v46  ;;  %v1939_v36 = vrot.slane %v1937_v46, 4  ;;  %v1884_v42 = vrot.slane %v4489_v26, 5  ;;  %v485_v35 = vshrl.u32 %v169_v23, 16 }
  0x9f   : > { %v1512_v5 = vsel %vm3978_vm5, %v1507_v24, %v1511_v17  ;;  %v1882_v41 = vsel %vm3920_vm2, %v3500_v18, %v1881_v33  ;;  %v1883_v1 = vrot.slane %v1881_v33, 4  ;;  %v488_v49 = vshll.u32 %v169_v23, 16  ;;  %v3813_v23 = vld [vmem:[%s3889_s14 + $0x10] sm:$0xf] }
  0xa0   : > { %2623 = vrot.lane.b32.xlu1 %v3637_v32, %s3858_s21  ;;  %v3629_v57 = vcombine.low %v1502_v15, %v1512_v5  ;;  %v1941_v44 = vsel %vm3920_vm2, %v1939_v36, %v1940_v19  ;;  %v487_v26 = vrot.slane %v485_v35, 4  ;;  %v494_v28 = vshll.u32 %v4541_v3, 16  ;;  %v3493_v15 = vld [vmem:[%s3889_s14 + $0x9c] sm:$0xe]  ;;  %v3815_v5 = vld [vmem:[%s3889_s14 + $0x4] sm:$0xf] }
  0xa1   : > { %v3652_v34 = vcombine.low %v1938_v27, %v1941_v44  ;;  %v1885_v43 = vsel %vm3920_vm2, %v1883_v1, %v1884_v42  ;;  %v490_v48 = vrot.slane %v488_v49, 5  ;;  %v498_v0 = vshrl.u32 %v4541_v3, 16  ;;  %v4569_v10 = vpop.permute.xlu1 %2107  ;;  %v3485_v36 = vld [vmem:[%s3889_s14 + $0x3c] sm:$0xe] }
  0xa2   : > { %2607 = vrot.lane.b32.xlu0 %v3629_v57, %s3858_s21  ;;  %v3644_v31 = vcombine.low %v1882_v41, %v1885_v43  ;;  %v496_v56 = vrot.slane %v494_v28, 5  ;;  %v504_v58 = vshll.u32 %v4551_v54, 16  ;;  %v293_v59 = vshrl.u32 %v153_v40, 16  ;;  %v3816_v41 = vld [vmem:[%s3889_s14] sm:$0xf] }
  0xa3   : > { %v491_v60 = vor.u32 %v490_v48, %v487_v26  ;;  %v500_v13 = vrot.slane %v498_v0, 4  ;;  %v296_v61 = vshll.u32 %v153_v40, 16  ;;  %v302_v62 = vshll.u32 %v4559_v9, 16  ;;  %v171_v28 = vld [vmem:[%s3889_s14 + $0x9c] sm:$0xf] }
  0xa4   : > { %2701 = vrot.lane.b32.xlu1 %v3652_v34, %s3859_s22  ;;  %v506_v63 = vrot.slane %v504_v58, 5  ;;  %v295_v12 = vrot.slane %v293_v59, 4  ;;  %v306_v38 = vshrl.u32 %v4559_v9, 16  ;;  %v312_v45 = vshll.u32 %v4567_v52, 16  ;;  %v3817_v58 = vld [vmem:[%s3889_s14 + $0x70] sm:$0xf] }
  0xa5   : > { %v492_v4 = vrot.slane %v491_v60, 4  ;;  %v501_v39 = vor.u32 %v500_v13, %v496_v56  ;;  %v298_v8 = vrot.slane %v296_v61, 5  ;;  %v304_v14 = vrot.slane %v302_v62, 5  ;;  %v4578_v20 = vpop.permute.xlu1 %2283  ;;  %v3818_v59 = vld [vmem:[%s3889_s14 + $0x6c] sm:$0xf] }
  0xa6   : > { %2685 = vrot.lane.b32.xlu0 %v3644_v31, %s3859_s22  ;;  %v308_v22 = vrot.slane %v306_v38, 4  ;;  %v3515_v17 = vcombine.low %v3814_v29, %v3813_v23  ;;  %v4583_v46 = vpop.permute.xlu0 %2105  ;;  %v314_v33 = vrot.slane %v312_v45, 5  ;;  %v3509_v27 = vrot.slane %v3493_v15, 9  ;;  %v4615_v13 = vld [vmem:[%s3889_s14 + $0xa0] sm:$0xf] }
  0xa7   : > { %v497_v19 = vsel %vm3978_vm5, %v492_v4, %v496_v56  ;;  %v502_v32 = vrot.slane %v501_v39, 4  ;;  %v299_v24 = vor.u32 %v298_v8, %v295_v12  ;;  %v3514_v1 = vcombine.low %v3816_v41, %v3815_v5  ;;  %v3819_v45 = vld [vmem:[%s3889_s14 + $0x64] sm:$0xf]  ;;  %v3820_v4 = vld [vmem:[%s3889_s14 + $0x60] sm:$0xf] }
  0xa8   : > { %v309_v18 = vor.u32 %v308_v22, %v304_v14  ;;  %v1944_v49 = vrot.slane %v4454_v55, 5  ;;  %v4595_v44 = vsel %vm2713_vm6, %v3515_v17, %v4531_v25  ;;  %v1947_v26 = vrot.slane %v4498_v51, 5  ;;  %v155_v8 = vld [vmem:[%s3889_s14 + $0x3c] sm:$0xf]  ;;  %v4634_v17 = vld [vmem:[%s3889_s14 + $0x40] sm:$0xf] }
  0xa9   : > { %v507_v42 = vsel %vm3978_vm5, %v502_v32, %v506_v63  ;;  %v300_v35 = vrot.slane %v299_v24, 4  ;;  %v4601_v43 = vpop.permute.xlu1 %2361  ;;  %v3501_v31 = vrot.slane %v3485_v36, 9  ;;  %v1888_v25 = vrot.slane %v4470_v2, 5  ;;  %v4620_v63 = vld [vmem:[%s3889_s14 + $0xa4] sm:$0x1] }
  0xaa   : > { %v3542_v40 = vcombine.low %v497_v19, %v507_v42  ;;  %v310_v57 = vrot.slane %v309_v18, 4  ;;  %v4599_v34 = vpop.permute.xlu0 %2267  ;;  %v1945_v48 = vsel %vm3920_vm2, %v3509_v27, %v1944_v49  ;;  %v1946_v0 = vrot.slane %v1944_v49, 4 }
  0xab   : > { %v305_v55 = vsel %vm3978_vm5, %v300_v35, %v304_v14  ;;  %v1891_v56 = vrot.slane %v4513_v50, 5  ;;  %v3523_v60 = vcombine.low %v3818_v59, %v3817_v58  ;;  %v509_v12 = vshrl.u32 %v171_v28, 16 }
  0xac   : > { %2113 = vrot.lane.b32.xlu1 %v3542_v40, %s3854_s17  ;;  %v315_v51 = vsel %vm3978_vm5, %v310_v57, %v314_v33  ;;  %v1948_v62 = vsel %vm3920_vm2, %v1946_v0, %v1947_v26  ;;  %v1889_v2 = vsel %vm3920_vm2, %v3501_v31, %v1888_v25  ;;  %v1890_v50 = vrot.slane %v1888_v25, 4  ;;  %v4644_v33 = vld [vmem:[%s3889_s14 + $0x44] sm:$0x1] }
  0xad   : > { %v3534_v61 = vcombine.low %v305_v55, %v315_v51  ;;  %v3653_v38 = vcombine.low %v1945_v48, %v1948_v62  ;;  %v3522_v39 = vcombine.low %v3820_v4, %v3819_v45  ;;  %v2716_v15 = vsel %vm2713_vm6, %v3514_v1, %v4561_v37 }
  0xae   : > { %v4627_v14 = vpop.permute.xlu0 %2345  ;;  %v511_v22 = vrot.slane %v509_v12, 4  ;;  %v512_v23 = vshll.u32 %v171_v28, 16  ;;  %v518_v29 = vshll.u32 %v4615_v13, 16  ;;  %v1892_v19 = vsel %vm3920_vm2, %v1890_v50, %v1891_v56 }
  0xaf   : > { %2097 = vrot.lane.b32.xlu0 %v3534_v61, %s3854_s17  ;;  %v2743_v32 = vsel %vm2713_vm6, %v3523_v60, %v4569_v10  ;;  %v522_v24 = vshrl.u32 %v4615_v13, 16  ;;  %v528_v18 = vshll.u32 %v4620_v63, 16  ;;  %v3645_v27 = vcombine.low %v1889_v2, %v1892_v19 }
  0xb0   : > { %2703 = vrot.lane.b32.xlu1 %v3653_v38, %s3859_s22  ;;  %v4646_v37 = vpop.permute.xlu1 %2363  ;;  %v514_v36 = vrot.slane %v512_v23, 5  ;;  %v520_v42 = vrot.slane %v518_v29, 5  ;;  %v317_v35 = vshrl.u32 %v155_v8, 16  ;;  %v2740_v5 = vsel %vm2713_vm6, %v3522_v39, %v4583_v46  ;;  %v592_v46 = vld [vmem:[%s3889_s14 + $0x90] sm:$0xe] }
  0xb1   : > { %v524_v41 = vrot.slane %v522_v24, 4  ;;  %v320_v1 = vshll.u32 %v155_v8, 16  ;;  %v326_v10 = vshll.u32 %v4634_v17, 16  ;;  %v330_v26 = vshrl.u32 %v4634_v17, 16  ;;  %v584_v38 = vld [vmem:[%s3889_s14 + $0x30] sm:$0xe] }
  0xb2   : > { %v4651_v49 = vpop.permute.xlu0 %2347  ;;  %v515_v40 = vor.u32 %v514_v36, %v511_v22  ;;  %v319_v57 = vrot.slane %v317_v35, 4  ;;  %v336_v28 = vshll.u32 %v4644_v33, 16  ;;  %v530_v48 = vrot.slane %v528_v18, 5 }
  0xb3   : > { %2687 = vrot.lane.b32.xlu0 %v3645_v27, %s3859_s22  ;;  %v525_v55 = vor.u32 %v524_v41, %v520_v42  ;;  %v322_v0 = vrot.slane %v320_v1, 5  ;;  %v328_v31 = vrot.slane %v326_v10, 5  ;;  %v2764_v25 = vsel %vm2762_vm7, %v2716_v15, %v4501_v53  ;;  %v585_v1 = vld [vmem:[%s3889_s14 + $0x3c] sm:$0xe] }
  0xb4   : > { %v4657_v51 = vpop.permute.xlu1 %2441  ;;  %v2780_v56 = vsel %vm2762_vm7, %v2740_v5, %v4482_v16  ;;  %v516_v58 = vrot.slane %v515_v40, 4  ;;  %v332_v59 = vrot.slane %v330_v26, 4  ;;  %v338_v62 = vrot.slane %v336_v28, 5 }
  0xb5   : > { %v526_v60 = vrot.slane %v525_v55, 4  ;;  %v323_v61 = vor.u32 %v322_v0, %v319_v57  ;;  %v2782_v12 = vsel %vm2762_vm7, %v2743_v32, %v4506_v47  ;;  %v3350_v53 = vrot.slane %v592_v46, 9  ;;  %v4707_v57 = vld [vmem:[%s3889_s14 + $0x9c] sm:$0xf] }
  0xb6   : > { %v4666_v2 = vpop.permute.xlu0 %2425  ;;  %v521_v50 = vsel %vm3978_vm5, %v516_v58, %v520_v42  ;;  %v333_v45 = vor.u32 %v332_v59, %v328_v31  ;;  %v733_v39 = vrot.slane %v4541_v3, 5  ;;  %v736_v8 = vrot.slane %v4551_v54, 5  ;;  %v593_v42 = vld [vmem:[%s3889_s14 + $0x9c] sm:$0xe]  ;;  %v4725_v58 = vld [vmem:[%s3889_s14 + $0xa0] sm:$0xf] }
  0xb7   : > { %v531_v16 = vsel %vm3978_vm5, %v526_v60, %v530_v48  ;;  %v324_v4 = vrot.slane %v323_v61, 4  ;;  %v3342_v23 = vrot.slane %v584_v38, 9  ;;  %v677_v29 = vrot.slane %v4559_v9, 5  ;;  %v3362_v46 = vld [vmem:[%s3889_s14 + $0x3c] sm:$0xf] }
  0xb8   : > { %v4674_v15 = vpop.permute.xlu1 %2443  ;;  %v3543_v47 = vcombine.low %v521_v50, %v531_v16  ;;  %v334_v22 = vrot.slane %v333_v45, 4  ;;  %v734_v32 = vsel %vm3920_vm2, %v3350_v53, %v733_v39  ;;  %v735_v24 = vrot.slane %v733_v39, 4  ;;  %v4749_v16 = vld [vmem:[%s3889_s14 + $0x40] sm:$0xf] }
  0xb9   : > { %v329_v19 = vsel %vm3978_vm5, %v324_v4, %v328_v31  ;;  %v680_v3 = vrot.slane %v4567_v52, 5  ;;  %v2766_v9 = vsel %vm2762_vm7, %v4595_v44, %v4526_v11  ;;  %v678_v27 = vsel %vm3920_vm2, %v3342_v23, %v677_v29 }
  0xba   : > { %v4682_v18 = vpop.permute.xlu0 %2427  ;;  %2115 = vrot.lane.b32.xlu1 %v3543_v47, %s3854_s17  ;;  %v339_v54 = vsel %vm3978_vm5, %v334_v22, %v338_v62  ;;  %v679_v36 = vrot.slane %v677_v29, 4  ;;  %v2815_v52 = vsel %vm2795_vm8, %v2782_v12, %v4578_v20  ;;  %v2799_v5 = vsel %vm2795_vm8, %v2766_v9, %v4599_v34  ;;  %v3380_v12 = vld [vmem:[%s3889_s14 + $0xa8] sm:$0xf]  ;;  %v4754_v47 = vld [vmem:[%s3889_s14 + $0xac] sm:$0xf] }
  0xbb   : > { %v3535_v35 = vcombine.low %v329_v19, %v339_v54  ;;  %v737_v41 = vsel %vm3920_vm2, %v735_v24, %v736_v8  ;;  %v2813_v44 = vsel %vm2795_vm8, %v2780_v56, %v4439_v7  ;;  %v3351_v34 = vrot.slane %v593_v42, 9  ;;  %v3364_v22 = vld [vmem:[%s3889_s14 + $0x48] sm:$0xf]  ;;  %v4761_v24 = vld [vmem:[%s3889_s14 + $0x4c] sm:$0xf] }
  0xbc   : > { %v4700_v10 = vpop.permute.xlu1 %2537  ;;  %v3558_v40 = vcombine.low %v734_v32, %v737_v41  ;;  %v681_v11 = vsel %vm3920_vm2, %v679_v36, %v680_v3  ;;  %v740_v26 = vrot.slane %v4615_v13, 5  ;;  %v743_v28 = vrot.slane %v4620_v63, 5  ;;  %v4779_v41 = vld [vmem:[%s3889_s14 + $0xa4] sm:$0x1] }
  0xbd   : > { %2099 = vrot.lane.b32.xlu0 %v3535_v35, %s3854_s17  ;;  %v3550_v20 = vcombine.low %v678_v27, %v681_v11  ;;  %v2797_v48 = vsel %vm2795_vm8, %v2764_v25, %v4476_v6  ;;  %v3343_v0 = vrot.slane %v585_v1, 9  ;;  %v684_v7 = vrot.slane %v4634_v17, 5 }
  0xbe   : > { %v4712_v55 = vpop.permute.xlu0 %2521  ;;  %2193 = vrot.lane.b32.xlu1 %v3558_v40, %s3853_s16  ;;  %v687_v31 = vrot.slane %v4644_v33, 5  ;;  %v2846_v56 = vsel %vm2828_vm9, %v2813_v44, %v4601_v43  ;;  %v741_v13 = vsel %vm3920_vm2, %v3351_v34, %v740_v26  ;;  %v742_v63 = vrot.slane %v740_v26, 4 }
  0xbf   : > { %v1097_v59 = vshrl.u32 %v4707_v57, 16  ;;  %v2830_v17 = vsel %vm2828_vm9, %v2797_v48, %v4627_v14  ;;  %v685_v33 = vsel %vm3920_vm2, %v3343_v0, %v684_v7  ;;  %v686_v25 = vrot.slane %v684_v7, 4 }
  0xc0   : > { %v4728_v6 = vpop.permute.xlu1 %2539  ;;  %v1100_v43 = vshll.u32 %v4707_v57, 16  ;;  %v744_v60 = vsel %vm3920_vm2, %v742_v63, %v743_v28  ;;  %v2848_v61 = vsel %vm2828_vm9, %v2815_v52, %v4646_v37  ;;  %v2832_v62 = vsel %vm2828_vm9, %v2799_v5, %v4651_v49 }
  0xc1   : > { %2177 = vrot.lane.b32.xlu0 %v3550_v20, %s3853_s16  ;;  %v905_v14 = vshrl.u32 %v3362_v46, 16  ;;  %v3559_v50 = vcombine.low %v741_v13, %v744_v60  ;;  %v688_v45 = vsel %vm3920_vm2, %v686_v25, %v687_v31  ;;  %v1110_v53 = vshrl.u32 %v4725_v58, 16  ;;  %v4801_v25 = vld [vmem:[%s3889_s14 + $0xb0] sm:$0x1] }
  0xc2   : > { %v4743_v38 = vpop.permute.xlu0 %2523  ;;  %v908_v4 = vshll.u32 %v3362_v46, 16  ;;  %v3551_v39 = vcombine.low %v685_v33, %v688_v45  ;;  %v1099_v8 = vrot.slane %v1097_v59, 4  ;;  %v1102_v37 = vrot.slane %v1100_v43, 5 }
  0xc3   : > { %v3574_v49 = vcombine.low %v4707_v57, %v4725_v58  ;;  %2195 = vrot.lane.b32.xlu1 %v3559_v50, %s3853_s16  ;;  %v907_v29 = vrot.slane %v905_v14, 4  ;;  %v1121_v19 = vshrl.u32 %v3380_v12, 16  ;;  %v1124_v32 = vshll.u32 %v3380_v12, 16 }
  0xc4   : > { %v4757_v23 = vpop.permute.xlu1 %2617  ;;  %v910_v3 = vrot.slane %v908_v4, 5  ;;  %v918_v54 = vshrl.u32 %v4749_v16, 16  ;;  %v3566_v9 = vcombine.low %v3362_v46, %v4749_v16  ;;  %v4768_v27 = vsel %vm2861_vm10, %v2846_v56, %v4657_v51  ;;  %v4783_v51 = vld [vmem:[%s3889_s14 + $0x44] sm:$0x1] }
  0xc5   : > { %2179 = vrot.lane.b32.xlu0 %v3551_v39, %s3853_s16  ;;  %v4774_v42 = vsel %vm2861_vm10, %v2830_v17, %v4666_v2  ;;  %v1123_v35 = vrot.slane %v1121_v19, 4  ;;  %v1134_v52 = vshrl.u32 %v4754_v47, 16  ;;  %v3575_v5 = vcombine.low %v3380_v12, %v4754_v47 }
  0xc6   : > { %v4770_v36 = vpop.permute.xlu0 %2601  ;;  %v1126_v1 = vrot.slane %v1124_v32, 5  ;;  %v929_v40 = vshrl.u32 %v3364_v22, 16  ;;  %v932_v11 = vshll.u32 %v3364_v22, 16  ;;  %v942_v44 = vshrl.u32 %v4761_v24, 16 }
  0xc7   : > { %2289 = vrot.lane.b32.xlu1 %v3574_v49, %s3852_s15  ;;  %v3567_v2 = vcombine.low %v3364_v22, %v4761_v24  ;;  %v4791_v20 = vsel %vm2861_vm10, %v2848_v61, %v4674_v15  ;;  %v1103_v34 = vor.u32 %v1102_v37, %v1099_v8  ;;  %v1106_v26 = vshll.u32 %v4725_v58, 16  ;;  %v4818_v22 = vld [vmem:[%s3889_s14 + $0x50] sm:$0x1] }
  0xc8   : > { %v4785_v57 = vpop.permute.xlu1 %2619  ;;  %v1112_v28 = vrot.slane %v1110_v53, 4  ;;  %v1116_v48 = vshll.u32 %v4779_v41, 16  ;;  %v911_v0 = vor.u32 %v910_v3, %v907_v29  ;;  %v914_v7 = vshll.u32 %v4749_v16, 16 }
  0xc9   : > { %2273 = vrot.lane.b32.xlu0 %v3566_v9, %s3852_s15  ;;  %v1104_v31 = vrot.slane %v1103_v34, 4  ;;  %v1108_v46 = vrot.slane %v1106_v26, 5  ;;  %v920_v56 = vrot.slane %v918_v54, 4  ;;  %v924_v13 = vshll.u32 %v4783_v51, 16 }
  0xca   : > { %v4798_v63 = vpop.permute.xlu0 %2603  ;;  %v931_v15 = vrot.slane %v929_v40, 4  ;;  %v934_v59 = vrot.slane %v932_v11, 5  ;;  %v912_v17 = vrot.slane %v911_v0, 4  ;;  %v916_v33 = vrot.slane %v914_v7, 5  ;;  %v3414_v40 = vld [vmem:[%s3889_s14 + $0x9c] sm:$0xe] }
  0xcb   : > { %2291 = vrot.lane.b32.xlu1 %v3575_v5, %s3852_s15  ;;  %v4806_v43 = vsel %vm2861_vm10, %v2832_v62, %v4682_v18  ;;  %v1109_v60 = vsel %vm3978_vm5, %v1104_v31, %v1108_v46  ;;  %v1113_v61 = vor.u32 %v1112_v28, %v1108_v46  ;;  %v1118_v14 = vrot.slane %v1116_v48, 5  ;;  %v3406_v28 = vld [vmem:[%s3889_s14 + $0x3c] sm:$0xe] }
  0xcc   : > { %v917_v12 = vsel %vm3978_vm5, %v912_v17, %v916_v33  ;;  %v921_v50 = vor.u32 %v920_v56, %v916_v33  ;;  %v926_v45 = vrot.slane %v924_v13, 5  ;;  %v1127_v53 = vor.u32 %v1126_v1, %v1123_v35  ;;  %v4813_v4 = vpop.permute.xlu1 %2697  ;;  %v3415_v33 = vld [vmem:[%s3889_s14 + $0xa8] sm:$0xe] }
  0xcd   : > { %2275 = vrot.lane.b32.xlu0 %v3567_v2, %s3852_s15  ;;  %v1114_v39 = vrot.slane %v1113_v61, 4  ;;  %v1130_v18 = vshll.u32 %v4754_v47, 16  ;;  %v1136_v62 = vrot.slane %v1134_v52, 4  ;;  %v1140_v8 = vshll.u32 %v4801_v25, 16 }
  0xce   : > { %v922_v37 = vrot.slane %v921_v50, 4  ;;  %v1128_v49 = vrot.slane %v1127_v53, 4  ;;  %v935_v29 = vor.u32 %v934_v59, %v931_v15  ;;  %v938_v19 = vshll.u32 %v4761_v24, 16  ;;  %v4823_v9 = vpop.permute.xlu0 %2681  ;;  %v3407_v53 = vld [vmem:[%s3889_s14 + $0x48] sm:$0xe] }
  0xcf   : > { %v1119_v32 = vsel %vm3978_vm5, %v1114_v39, %v1118_v14  ;;  %v1132_v3 = vrot.slane %v1130_v18, 5  ;;  %v944_v54 = vrot.slane %v942_v44, 4  ;;  %v1142_v34 = vrot.slane %v1140_v8, 5 }
  0xd0   : > { %v3590_v35 = vcombine.low %v1109_v60, %v1119_v32  ;;  %v927_v52 = vsel %vm3978_vm5, %v922_v37, %v926_v45  ;;  %v936_v5 = vrot.slane %v935_v29, 4  ;;  %v940_v1 = vrot.slane %v938_v19, 5  ;;  %v3786_v29 = vld [vmem:[%s5802_s1 + $0x10] ss:$0 sps:$4 sm:$0x33]  }
  0xd1   : > { %v3582_v11 = vcombine.low %v917_v12, %v927_v52  ;;  %v1137_v2 = vor.u32 %v1136_v62, %v1132_v3  ;;  %v948_v26 = vshll.u32 %v4818_v22, 16  ;;  %v2912_v44 = vsel %vm2894_vm11, %v4768_v27, %v4700_v10  ;;  %v4872_v19 = vld [vmem:[%s3889_s14 + $0xa8] sm:$0xf]  ;;  %3743 = vmatprep.subr.msk.bf16.mxu0 %vm3046_vm13, %v3786_v29  ;;  %3744 = vmatprep.subr.msk.bf16.mxu1 %vm3046_vm13, %v3786_v29 }
  0xd2   : > { %2369 = vrot.lane.b32.xlu1 %v3590_v35, %s3855_s18  ;;  %v1133_v48 = vsel %vm3978_vm5, %v1128_v49, %v1132_v3  ;;  %v941_v0 = vsel %vm3978_vm5, %v936_v5, %v940_v1  ;;  %v945_v7 = vor.u32 %v944_v54, %v940_v1  ;;  %v3430_v13 = vrot.slane %v3414_v40, 9  ;;  %v4889_v5 = vld [vmem:[%s3889_s14 + $0x48] sm:$0xf] }
  0xd3   : > { %2353 = vrot.lane.b32.xlu0 %v3582_v11, %s3855_s18  ;;  %v1138_v46 = vrot.slane %v1137_v2, 4  ;;  %v950_v56 = vrot.slane %v948_v26, 5  ;;  %v1342_v15 = vrot.slane %v4725_v58, 5  ;;  %v1345_v10 = vrot.slane %v4779_v41, 5  ;;  %v3789_v26 = vld [vmem:[%s5802_s1 + $0x8] sm:$0xff]  }
  0xd4   : > { %v4838_v31 = vpop.permute.xlu1 %2109  ;;  %v946_v59 = vrot.slane %v945_v7, 4  ;;  %v3422_v27 = vrot.slane %v3406_v28, 9  ;;  %v1286_v17 = vrot.slane %v4749_v16, 5  ;;  %v1289_v12 = vrot.slane %v4783_v51, 5  ;;  %v4923_v28 = vld [vmem:[%s3889_s14 + $0xb4] sm:$0xf] }
  0xd5   : > { %v1143_v60 = vsel %vm3978_vm5, %v1138_v46, %v1142_v34  ;;  %v1343_v61 = vsel %vm3920_vm2, %v3430_v13, %v1342_v15  ;;  %v1344_v14 = vrot.slane %v1342_v15, 4  ;;  %v3431_v62 = vrot.slane %v3415_v33, 9  ;;  %v4933_v7 = vld [vmem:[%s3889_s14 + $0x54] sm:$0xf] }
  0xd6   : > { %v3591_v58 = vcombine.low %v1133_v48, %v1143_v60  ;;  %v951_v41 = vsel %vm3978_vm5, %v946_v59, %v950_v56  ;;  %v1287_v16 = vsel %vm3920_vm2, %v3422_v27, %v1286_v17  ;;  %v1288_v45 = vrot.slane %v1286_v17, 4 }
  0xd7   : > { %v4850_v50 = vpop.permute.xlu0 %2093  ;;  %v3583_v39 = vcombine.low %v941_v0, %v951_v41  ;;  %v1346_v18 = vsel %vm3920_vm2, %v1344_v14, %v1345_v10  ;;  %v2896_v51 = vsel %vm2894_vm11, %v4774_v42, %v4712_v55  ;;  %v2914_v8 = vsel %vm2894_vm11, %v4791_v20, %v4728_v6  ;;  %v4940_v10 = vld [vmem:[%s3889_s14 + $0xb8] sm:$0xf] }
  0xd8   : > { %2371 = vrot.lane.b32.xlu1 %v3591_v58, %s3855_s18  ;;  %v3606_v37 = vcombine.low %v1343_v61, %v1346_v18  ;;  %v1290_v49 = vsel %vm3920_vm2, %v1288_v45, %v1289_v12  ;;  %v4874_v32 = vpop.permute.xlu1 %2699  ;;  %v1349_v42 = vrot.slane %v4754_v47, 5  ;;  %v1352_v6 = vrot.slane %v4801_v25, 5  ;;  %v4894_v25 = vld [vmem:[%s3889_s14 + $0xac] sm:$0xf]  ;;  %v4947_v61 = vld [vmem:[%s3889_s14 + $0x58] sm:$0xf] }
  0xd9   : > { %2355 = vrot.lane.b32.xlu0 %v3583_v39, %s3855_s18  ;;  %v3598_v55 = vcombine.low %v1287_v16, %v1290_v49  ;;  %v3423_v20 = vrot.slane %v3407_v53, 9  ;;  %v2898_v3 = vsel %vm2894_vm11, %v4806_v43, %v4743_v38  ;;  %v4884_v54 = vsel %vm2927_vm12, %v2912_v44, %v4757_v23  ;;  %v3794_v49 = vld [vmem:[%s5802_s1] sm:$0xff]  }
  0xda   : > { %v1293_v35 = vrot.slane %v4761_v24, 5  ;;  %v1296_v52 = vrot.slane %v4818_v22, 5  ;;  %v1350_v47 = vsel %vm3920_vm2, %v3431_v62, %v1349_v42  ;;  %v1351_v1 = vrot.slane %v1349_v42, 4  ;;  %v4961_v62 = vld [vmem:[%s3889_s14 + $0xb0] sm:$0x1] }
  0xdb   : > { %v1706_v38 = vshrl.u32 %v4872_v19, 16  ;;  %v4897_v43 = vpop.permute.xlu0 %2683  ;;  %v2929_v23 = vsel %vm2927_vm12, %v2896_v51, %v4770_v36  ;;  %v1709_v40 = vshll.u32 %v4872_v19, 16  ;;  %v4911_v2 = vsel %vm2927_vm12, %v2914_v8, %v4785_v57 }
  0xdc   : > { %2449 = vrot.lane.b32.xlu1 %v3606_v37, %s3856_s19  ;;  %v1294_v24 = vsel %vm3920_vm2, %v3423_v20, %v1293_v35  ;;  %v1295_v22 = vrot.slane %v1293_v35, 4  ;;  %v1353_v11 = vsel %vm3920_vm2, %v1351_v1, %v1352_v6  ;;  %v4915_v36 = vsel %vm2927_vm12, %v2898_v3, %v4798_v63  ;;  %v4929_v63 = vld [vmem:[%s3889_s14 + $0x4c] sm:$0xf] }
  0xdd   : > { %2433 = vrot.lane.b32.xlu0 %v3598_v55, %s3856_s19  ;;  %v1514_v34 = vshrl.u32 %v4889_v5, 16  ;;  %v3607_v44 = vcombine.low %v1350_v47, %v1353_v11  ;;  %v1719_v48 = vshrl.u32 %v4894_v25, 16  ;;  %v1517_v0 = vshll.u32 %v4889_v5, 16 }
  0xde   : > { %v1297_v57 = vsel %vm3920_vm2, %v1295_v22, %v1296_v52  ;;  %v1708_v13 = vrot.slane %v1706_v38, 4  ;;  %v1711_v15 = vrot.slane %v1709_v40, 5  ;;  %v3622_v59 = vcombine.low %v4872_v19, %v4894_v25  ;;  %v4984_v52 = vld [vmem:[%s3889_s14 + $0x50] sm:$0x1] }
  0xdf   : > { %v3599_v56 = vcombine.low %v1294_v24, %v1297_v57  ;;  %v1516_v27 = vrot.slane %v1514_v34, 4  ;;  %v3048_v17 = vsel %vm3046_vm13, %v3786_v29, 0  ;;  %v1730_v33 = vshrl.u32 %v4923_v28, 16 }
  0xe0   : > { %v4935_v46 = vpop.permute.xlu1 %2111  ;;  %2451 = vrot.lane.b32.xlu1 %v3607_v44, %s3856_s19  ;;  %v1733_v60 = vshll.u32 %v4923_v28, 16  ;;  %v1519_v14 = vrot.slane %v1517_v0, 5  ;;  %v1527_v12 = vshrl.u32 %v4929_v63, 16  ;;  %v3614_v58 = vcombine.low %v4889_v5, %v4929_v63  ;;  %3700 = vmatpush3.bf16.msra.mxu0 %v3048_v17 }
  0xe1   : > { %2435 = vrot.lane.b32.xlu0 %v3599_v56, %s3856_s19  ;;  %v1538_v41 = vshrl.u32 %v4933_v7, 16  ;;  %3740 = vmatpush3.bf16.msra.mxu1 %v3048_v17  ;;  %v1732_v45 = vrot.slane %v1730_v33, 4  ;;  %v1743_v53 = vshrl.u32 %v4940_v10, 16  ;;  %v3623_v39 = vcombine.low %v4923_v28, %v4940_v10 }
  0xe2   : > { %3701 = vmatprep.subr.bf16.mxu0 %v3789_v26  ;;  %v1541_v18 = vshll.u32 %v4933_v7, 16  ;;  %3738 = vmatprep.subr.bf16.mxu1 %v3789_v26  ;;  %v1735_v8 = vrot.slane %v1733_v60, 5  ;;  %v1551_v37 = vshrl.u32 %v4947_v61, 16  ;;  %v3615_v19 = vcombine.low %v4933_v7, %v4947_v61 }
  0xe3   : > { %v4954_v16 = vpop.permute.xlu0 %2095  ;;  %v4970_v29 = vrot.slane %v1538_v41, 4  ;;  %v2962_v55 = vsel %vm2960_vm14, %v2929_v23, %v4823_v9  ;;  %v2978_v42 = vsel %vm2960_vm14, %v4884_v54, %v4813_v4  ;;  %v1712_v6 = vor.u32 %v1711_v15, %v1708_v13  ;;  %v3821_v9 = vld [vmem:[%s3889_s14 + $0x78] sm:$0xf]  ;;  %v3822_v4 = vld [vmem:[%s3889_s14 + $0x7c] sm:$0xf] }
  0xe4   : > { %v4963_v51 = vpop.permute.xlu1 %2189  ;;  %2545 = vrot.lane.b32.xlu1 %v3622_v59, %s3857_s20  ;;  %3705 = vmatprep.mubr.msk.bf16.mxu0 %vm3013_vm15, %v2962_v55  ;;  %v1715_v20 = vshll.u32 %v4894_v25, 16  ;;  %v1721_v3 = vrot.slane %v1719_v48, 4  ;;  %v1725_v35 = vshll.u32 %v4961_v62, 16  ;;  %v1543_v47 = vrot.slane %v1541_v18, 5  ;;  %v5000_v48 = vld [vmem:[%s3889_s14 + $0xbc] sm:$0x1] }
  0xe5   : > { %2529 = vrot.lane.b32.xlu0 %v3614_v58, %s3857_s20  ;;  %3721 = vmatprep.mubr.msk.bf16.mxu1 %vm3013_vm15, %v2978_v42  ;;  %v3524_v54 = vcombine.low %v3821_v9, %v3822_v4  ;;  %v1520_v1 = vor.u32 %v1519_v14, %v1516_v27  ;;  %v1523_v38 = vshll.u32 %v4929_v63, 16  ;;  %v1713_v24 = vrot.slane %v1712_v6, 4  ;;  %v5014_v27 = vld [vmem:[%s3889_s14 + $0x5c] sm:$0x1]  ;;  %v3486_v9 = vld [vmem:[%s3889_s14 + $0x48] sm:$0xe] }
  0xe6   : > { %3702 = vmatpush3.bf16.msra.mxu0 %v3789_v26  ;;  %3741 = vmatpush3.bf16.msra.mxu1 %v3789_v26  ;;  %v1717_v22 = vrot.slane %v1715_v20, 5  ;;  %v1727_v40 = vrot.slane %v1725_v35, 5  ;;  %v1529_v11 = vrot.slane %v1527_v12, 4  ;;  %v1533_v44 = vshll.u32 %v4984_v52, 16 }
  0xe7   : > { %v4986_v5 = vpop.permute.xlu0 %2173  ;;  %3703 = vmatprep.subr.bf16.mxu0 %v3794_v49  ;;  %3739 = vmatprep.subr.bf16.mxu1 %v3794_v49  ;;  %v1521_v34 = vrot.slane %v1520_v1, 4  ;;  %v1525_v28 = vrot.slane %v1523_v38, 5  ;;  %v2980_v57 = vsel %vm2960_vm14, %v4911_v2, %v4874_v32  ;;  %v2964_v7 = vsel %vm2960_vm14, %v4915_v36, %v4897_v43 }
  0xe8   : > { %v4992_v23 = vpop.permute.xlu1 %2191  ;;  %2547 = vrot.lane.b32.xlu1 %v3623_v39, %s3857_s20  ;;  %v1718_v26 = vsel %vm3978_vm5, %v1713_v24, %v1717_v22  ;;  %v1722_v0 = vor.u32 %v1721_v3, %v1717_v22  ;;  %v1736_v56 = vor.u32 %v1735_v8, %v1732_v45  ;;  %v1535_v2 = vrot.slane %v1533_v44, 5  ;;  %v3823_v45 = vld [vmem:[%s3889_s14 + $0x18] sm:$0xf]  ;;  %v3824_v39 = vld [vmem:[%s3889_s14 + $0x1c] sm:$0xf] }
  0xe9   : > { %2531 = vrot.lane.b32.xlu0 %v3615_v19, %s3857_s20  ;;  %v1526_v15 = vsel %vm3978_vm5, %v1521_v34, %v1525_v28  ;;  %v1530_v32 = vor.u32 %v1529_v11, %v1525_v28  ;;  %v1739_v59 = vshll.u32 %v4940_v10, 16  ;;  %v1745_v36 = vrot.slane %v1743_v53, 4  ;;  %v3494_v19 = vld [vmem:[%s3889_s14 + $0xa8] sm:$0xe] }
  0xea   : > { %3704 = vmatpush3.bf16.msra.mxu0 %v3794_v49  ;;  %v1723_v33 = vrot.slane %v1722_v0, 4  ;;  %3742 = vmatpush3.bf16.msra.mxu1 %v3794_v49  ;;  %v1737_v43 = vrot.slane %v1736_v56, 4  ;;  %v1749_v60 = vshll.u32 %v5000_v48, 16  ;;  %v1544_v58 = vor.u32 %v1543_v47, %v4970_v29 }
  0xeb   : > { %v5008_v13 = vpop.permute.xlu0 %2175  ;;  %v1531_v14 = vrot.slane %v1530_v32, 4  ;;  %v1741_v12 = vrot.slane %v1739_v59, 5  ;;  %v1547_v41 = vshll.u32 %v4947_v61, 16  ;;  %v3516_v18 = vcombine.low %v3823_v45, %v3824_v39  ;;  %v3828_v59 = vld [vmem:[%s3889_s14 + $0x28] sm:$0xf] }
  0xec   : > { %v5016_v17 = vpop.permute.xlu1 %2285  ;;  %v1728_v8 = vsel %vm3978_vm5, %v1723_v33, %v1727_v40  ;;  %v1553_v49 = vrot.slane %v1551_v37, 4  ;;  %v1557_v53 = vshll.u32 %v5014_v27, 16  ;;  %v1751_v20 = vrot.slane %v1749_v60, 5  ;;  %v5070_v60 = vld [vmem:[%s3889_s14 + $0xac] sm:$0xf] }
  0xed   : > { %3706 = vmatmul.mubr.msk.bf16.vlgmr.msra.gmra.mxu0 %vm3013_vm15, %v2964_v7  ;;  %v3638_v29 = vcombine.low %v1718_v26, %v1728_v8  ;;  %v1536_v42 = vsel %vm3978_vm5, %v1531_v14, %v1535_v2  ;;  %v1746_v6 = vor.u32 %v1745_v36, %v1741_v12  ;;  %3722 = vmatmul.mubr.msk.bf16.vlgmr.msra.gmra.mxu1 %vm3013_vm15, %v2980_v57  ;;  %v1545_v47 = vrot.slane %v1544_v58, 4  ;;  %v173_v26 = vld [vmem:[%s3889_s14 + $0xa8] sm:$0xf]  ;;  %v3827_v2 = vld [vmem:[%s3889_s14 + $0x24] sm:$0xf] }
  0xee   : > { %v3630_v35 = vcombine.low %v1526_v15, %v1536_v42  ;;  %v1549_v37 = vrot.slane %v1547_v41, 5  ;;  %v5040_v4 = vsel %vm2713_vm6, %v3524_v54, %v4838_v31  ;;  %v1742_v1 = vsel %vm3978_vm5, %v1737_v43, %v1741_v12  ;;  %v3826_v15 = vld [vmem:[%s3889_s14 + $0x88] sm:$0xf]  ;;  %v5078_v58 = vld [vmem:[%s3889_s14 + $0xb0] sm:$0x1] }
  0xef   : > { %v5030_v55 = vpop.permute.xlu0 %2269  ;;  %2625 = vrot.lane.b32.xlu1 %v3638_v29, %s3858_s21  ;;  %v1747_v38 = vrot.slane %v1746_v6, 4  ;;  %v3510_v24 = vrot.slane %v3494_v19, 9  ;;  %v1559_v40 = vrot.slane %v1557_v53, 5  ;;  %v1951_v11 = vrot.slane %v4894_v25, 5  ;;  %v157_v39 = vld [vmem:[%s3889_s14 + $0x48] sm:$0xf] }
  0xf0   : > { %v5035_v3 = vpop.permute.xlu1 %2287  ;;  %2609 = vrot.lane.b32.xlu0 %v3630_v35, %s3858_s21  ;;  %v1554_v22 = vor.u32 %v1553_v49, %v1549_v37  ;;  %v1954_v34 = vrot.slane %v4961_v62, 5  ;;  %v5052_v54 = vsel %vm2713_vm6, %v3516_v18, %v4850_v50  ;;  %v1550_v44 = vsel %vm3978_vm5, %v1545_v47, %v1549_v37  ;;  %v3825_v50 = vld [vmem:[%s3889_s14 + $0x84] sm:$0xf]  ;;  %v5088_v6 = vld [vmem:[%s3889_s14 + $0x4c] sm:$0xf] }
  0xf1   : > { %v1752_v28 = vsel %vm3978_vm5, %v1747_v38, %v1751_v20  ;;  %v3502_v57 = vrot.slane %v3486_v9, 9  ;;  %v1952_v62 = vsel %vm3920_vm2, %v3510_v24, %v1951_v11  ;;  %v1953_v7 = vrot.slane %v1951_v11, 4  ;;  %v5101_v9 = vld [vmem:[%s3889_s14 + $0x50] sm:$0x1] }
  0xf2   : > { %v3639_v25 = vcombine.low %v1742_v1, %v1752_v28  ;;  %v1555_v0 = vrot.slane %v1554_v22, 4  ;;  %v3525_v32 = vcombine.low %v3825_v50, %v3826_v15  ;;  %v3517_v33 = vcombine.low %v3827_v2, %v3828_v59  ;;  %v3487_v59 = vld [vmem:[%s3889_s14 + $0x54] sm:$0xe] }
  0xf3   : > { %v5048_v31 = vpop.permute.xlu0 %2271  ;;  %v1895_v43 = vrot.slane %v4929_v63, 5  ;;  %v1898_v36 = vrot.slane %v4984_v52, 5  ;;  %v1955_v12 = vsel %vm3920_vm2, %v1953_v7, %v1954_v34  ;;  %v533_v41 = vshrl.u32 %v173_v26, 16 }
  0xf4   : > { %2627 = vrot.lane.b32.xlu1 %v3639_v25, %s3858_s21  ;;  %v1560_v14 = vsel %vm3978_vm5, %v1555_v0, %v1559_v40  ;;  %v536_v45 = vshll.u32 %v173_v26, 16  ;;  %v3654_v18 = vcombine.low %v1952_v62, %v1955_v12  ;;  %v542_v29 = vshll.u32 %v5070_v60, 16  ;;  %v3495_v62 = vld [vmem:[%s3889_s14 + $0xb4] sm:$0xe] }
  0xf5   : > { %v5061_v56 = vpop.permute.xlu1 %2365  ;;  %v3631_v52 = vcombine.low %v1550_v44, %v1560_v14  ;;  %v1896_v8 = vsel %vm3920_vm2, %v3502_v57, %v1895_v43  ;;  %v1897_v49 = vrot.slane %v1895_v43, 4  ;;  %v535_v53 = vrot.slane %v533_v41, 4 }
  0xf6   : > { %v538_v19 = vrot.slane %v536_v45, 5  ;;  %v546_v42 = vshrl.u32 %v5070_v60, 16  ;;  %v5095_v35 = vsel %vm2713_vm6, %v3525_v32, %v4935_v46  ;;  %v552_v37 = vshll.u32 %v5078_v58, 16 }
  0xf7   : > { %v5081_v63 = vpop.permute.xlu0 %2349  ;;  %2611 = vrot.lane.b32.xlu0 %v3631_v52, %s3858_s21  ;;  %v1899_v47 = vsel %vm3920_vm2, %v1897_v49, %v1898_v36  ;;  %v341_v1 = vshrl.u32 %v157_v39, 16  ;;  %v544_v22 = vrot.slane %v542_v29, 5  ;;  %v344_v28 = vshll.u32 %v157_v39, 16  ;;  %v175_v52 = vld [vmem:[%s3889_s14 + $0xb4] sm:$0xf] }
  0xf8   : > { %2705 = vrot.lane.b32.xlu1 %v3654_v18, %s3859_s22  ;;  %v3646_v38 = vcombine.low %v1896_v8, %v1899_v47  ;;  %v539_v24 = vor.u32 %v538_v19, %v535_v53  ;;  %v548_v40 = vrot.slane %v546_v42, 4  ;;  %v554_v46 = vrot.slane %v552_v37, 5 }
  0xf9   : > { %v5090_v20 = vpop.permute.xlu1 %2367  ;;  %v343_v34 = vrot.slane %v341_v1, 4  ;;  %v350_v44 = vshll.u32 %v5088_v6, 16  ;;  %v354_v25 = vshrl.u32 %v5088_v6, 16  ;;  %v360_v0 = vshll.u32 %v5101_v9, 16 }
  0xfa   : > { %v540_v57 = vrot.slane %v539_v24, 4  ;;  %v549_v26 = vor.u32 %v548_v40, %v544_v22  ;;  %v5114_v50 = vsel %vm2713_vm6, %v3517_v33, %v4954_v16  ;;  %v5120_v15 = vsel %vm2762_vm7, %v5040_v4, %v4963_v51 }
  0xfb   : > { %v5104_v11 = vpop.permute.xlu0 %2351  ;;  %2689 = vrot.lane.b32.xlu0 %v3646_v38, %s3859_s22  ;;  %v346_v32 = vrot.slane %v344_v28, 5  ;;  %v352_v2 = vrot.slane %v350_v44, 5  ;;  %v5126_v43 = vsel %vm2762_vm7, %v5052_v54, %v4986_v5  ;;  %v356_v36 = vrot.slane %v354_v25, 4 }
  0xfc   : > { %v545_v16 = vsel %vm3978_vm5, %v540_v57, %v544_v22  ;;  %v550_v33 = vrot.slane %v549_v26, 4  ;;  %v362_v41 = vrot.slane %v360_v0, 5  ;;  %v3511_v51 = vrot.slane %v3495_v62, 9  ;;  %v5156_v22 = vld [vmem:[%s3889_s14 + $0xbc] sm:$0x1] }
  0xfd   : > { %v5110_v7 = vpop.permute.xlu1 %2445  ;;  %v347_v12 = vor.u32 %v346_v32, %v343_v34  ;;  %v1958_v4 = vrot.slane %v4940_v10, 5  ;;  %v357_v39 = vor.u32 %v356_v36, %v352_v2  ;;  %v1961_v5 = vrot.slane %v5000_v48, 5  ;;  %v5145_v48 = vld [vmem:[%s3889_s14 + $0xb8] sm:$0xf] }
  0xfe   : > { %v555_v45 = vsel %vm3978_vm5, %v550_v33, %v554_v46  ;;  %v3503_v54 = vrot.slane %v3487_v59, 9  ;;  %v750_v10 = vrot.slane %v5078_v58, 5  ;;  %v1902_v42 = vrot.slane %v4947_v61, 5  ;;  %v5167_v62 = vld [vmem:[%s3889_s14 + $0x58] sm:$0xf] }
  0xff   : > { %v5130_v14 = vpop.permute.xlu0 %2429  ;;  %v3544_v8 = vcombine.low %v545_v16, %v555_v45  ;;  %v348_v49 = vrot.slane %v347_v12, 4  ;;  %v1959_v53 = vsel %vm3920_vm2, %v3511_v51, %v1958_v4  ;;  %v1960_v19 = vrot.slane %v1958_v4, 4  ;;  %v5174_v16 = vld [vmem:[%s3889_s14 + $0x5c] sm:$0x1] }
 0x100   : > { %v358_v29 = vrot.slane %v357_v39, 4  ;;  %v1905_v47 = vrot.slane %v5014_v27, 5  ;;  %v694_v38 = vrot.slane %v5101_v9, 5  ;;  %v557_v61 = vshrl.u32 %v175_v52, 16  ;;  %v159_v27 = vld [vmem:[%s3889_s14 + $0x54] sm:$0xf] }
 0x101   : > { %v5137_v18 = vpop.permute.xlu1 %2447  ;;  %2117 = vrot.lane.b32.xlu1 %v3544_v8, %s3854_s17  ;;  %v353_v1 = vsel %vm3978_vm5, %v348_v49, %v352_v2  ;;  %v1962_v24 = vsel %vm3920_vm2, %v1960_v19, %v1961_v5  ;;  %v1903_v34 = vsel %vm3920_vm2, %v3503_v54, %v1902_v42  ;;  %v1904_v28 = vrot.slane %v1902_v42, 4  ;;  %v586_v42 = vld [vmem:[%s3889_s14 + $0x48] sm:$0xe] }
 0x102   : > { %v363_v40 = vsel %vm3978_vm5, %v358_v29, %v362_v41  ;;  %v3655_v46 = vcombine.low %v1959_v53, %v1962_v24  ;;  %v559_v26 = vrot.slane %v557_v61, 4  ;;  %v560_v25 = vshll.u32 %v175_v52, 16  ;;  %v594_v52 = vld [vmem:[%s3889_s14 + $0xa8] sm:$0xe] }
 0x103   : > { %v5147_v37 = vpop.permute.xlu0 %2431  ;;  %v3536_v57 = vcombine.low %v353_v1, %v363_v40  ;;  %v566_v0 = vshll.u32 %v5145_v48, 16  ;;  %v1906_v32 = vsel %vm3920_vm2, %v1904_v28, %v1905_v47  ;;  %v570_v2 = vshrl.u32 %v5145_v48, 16 }
 0x104   : > { %v576_v59 = vshll.u32 %v5156_v22, 16  ;;  %v365_v33 = vshrl.u32 %v159_v27, 16  ;;  %v3647_v12 = vcombine.low %v1903_v34, %v1906_v32  ;;  %v562_v41 = vrot.slane %v560_v25, 5  ;;  %v595_v32 = vld [vmem:[%s3889_s14 + $0xb4] sm:$0xe] }
 0x105   : > { %v5163_v44 = vpop.permute.xlu1 %2541  ;;  %2101 = vrot.lane.b32.xlu0 %v3536_v57, %s3854_s17  ;;  %2707 = vrot.lane.b32.xlu1 %v3655_v46, %s3859_s22  ;;  %v568_v51 = vrot.slane %v566_v0, 5  ;;  %v368_v4 = vshll.u32 %v159_v27, 16  ;;  %v2786_v45 = vsel %vm2762_vm7, %v5095_v35, %v4992_v23  ;;  %v572_v39 = vrot.slane %v570_v2, 4 }
 0x106   : > { %v367_v5 = vrot.slane %v365_v33, 4  ;;  %v374_v54 = vshll.u32 %v5167_v62, 16  ;;  %v563_v49 = vor.u32 %v562_v41, %v559_v26  ;;  %v378_v19 = vshrl.u32 %v5167_v62, 16 }
 0x107   : > { %v5176_v36 = vpop.permute.xlu0 %2525  ;;  %v370_v53 = vrot.slane %v368_v4, 5  ;;  %v384_v29 = vshll.u32 %v5174_v16, 16  ;;  %v2770_v47 = vsel %vm2762_vm7, %v5114_v50, %v5008_v13  ;;  %v573_v1 = vor.u32 %v572_v39, %v568_v51 }
 0x108   : > { %v578_v23 = vrot.slane %v576_v59, 5  ;;  %v376_v35 = vrot.slane %v374_v54, 5  ;;  %v564_v24 = vrot.slane %v563_v49, 4  ;;  %v380_v27 = vrot.slane %v378_v19, 4 }
 0x109   : > { %v5185_v8 = vpop.permute.xlu1 %2543  ;;  %2691 = vrot.lane.b32.xlu0 %v3647_v12, %s3859_s22  ;;  %v371_v61 = vor.u32 %v370_v53, %v367_v5  ;;  %v386_v40 = vrot.slane %v384_v29, 5  ;;  %v574_v34 = vrot.slane %v573_v1, 4  ;;  %v3352_v28 = vrot.slane %v594_v52, 9 }
 0x10a   : > { %v747_v57 = vrot.slane %v5070_v60, 5  ;;  %v3344_v26 = vrot.slane %v586_v42, 9  ;;  %v569_v13 = vsel %vm3978_vm5, %v564_v24, %v568_v51  ;;  %v381_v25 = vor.u32 %v380_v27, %v376_v35  ;;  %v3382_v42 = vld [vmem:[%s3889_s14 + $0xb4] sm:$0xf] }
 0x10b   : > { %v5194_v46 = vpop.permute.xlu0 %2527  ;;  %v372_v50 = vrot.slane %v371_v61, 4  ;;  %v691_v0 = vrot.slane %v5088_v6, 5  ;;  %v2817_v2 = vsel %vm2795_vm8, %v5120_v15, %v5016_v17  ;;  %v579_v59 = vsel %vm3978_vm5, %v574_v34, %v578_v23  ;;  %v587_v17 = vld [vmem:[%s3889_s14 + $0x54] sm:$0xe] }
 0x10c   : > { %v748_v60 = vsel %vm3920_vm2, %v3352_v28, %v747_v57  ;;  %v749_v33 = vrot.slane %v747_v57, 4  ;;  %v2801_v41 = vsel %vm2795_vm8, %v5126_v43, %v5030_v55  ;;  %v3545_v51 = vcombine.low %v569_v13, %v579_v59  ;;  %v5263_v28 = vld [vmem:[%s3889_s14 + $0x58] sm:$0xf] }
 0x10d   : > { %v377_v6 = vsel %vm3978_vm5, %v372_v50, %v376_v35  ;;  %v382_v4 = vrot.slane %v381_v25, 4  ;;  %v692_v39 = vsel %vm3920_vm2, %v3344_v26, %v691_v0  ;;  %v693_v5 = vrot.slane %v691_v0, 4  ;;  %v5241_v35 = vld [vmem:[%s3889_s14 + $0x54] sm:$0xf]  ;;  %v3384_v26 = vld [vmem:[%s3889_s14 + $0xc0] sm:$0xf] }
 0x10e   : > { %v5208_v12 = vpop.permute.xlu1 %2621  ;;  %v751_v15 = vsel %vm3920_vm2, %v749_v33, %v750_v10  ;;  %v3353_v54 = vrot.slane %v595_v32, 9  ;;  %2119 = vrot.lane.b32.xlu1 %v3545_v51, %s3854_s17  ;;  %v754_v52 = vrot.slane %v5145_v48, 5  ;;  %v757_v49 = vrot.slane %v5156_v22, 5  ;;  %v3368_v33 = vld [vmem:[%s3889_s14 + $0x60] sm:$0xf] }
 0x10f   : > { %v387_v55 = vsel %vm3978_vm5, %v382_v4, %v386_v40  ;;  %v3560_v43 = vcombine.low %v748_v60, %v751_v15  ;;  %v5227_v58 = vpop.permute.xlu0 %2605  ;;  %v695_v53 = vsel %vm3920_vm2, %v693_v5, %v694_v38  ;;  %v3345_v19 = vrot.slane %v587_v17, 9  ;;  %v5286_v4 = vld [vmem:[%s3889_s14 + $0x64] sm:$0xf] }
 0x110   : > { %v3537_v10 = vcombine.low %v377_v6, %v387_v55  ;;  %v698_v29 = vrot.slane %v5167_v62, 5  ;;  %v2819_v1 = vsel %vm2795_vm8, %v2786_v45, %v5035_v3  ;;  %v755_v48 = vsel %vm3920_vm2, %v3353_v54, %v754_v52  ;;  %v5249_v45 = vld [vmem:[%s3889_s14 + $0xb8] sm:$0xf]  ;;  %v5299_v54 = vld [vmem:[%s3889_s14 + $0xbc] sm:$0x1] }
 0x111   : > { %v756_v22 = vrot.slane %v754_v52, 4  ;;  %v701_v23 = vrot.slane %v5174_v16, 5  ;;  %v2803_v9 = vsel %vm2795_vm8, %v2770_v47, %v5048_v31  ;;  %v3552_v38 = vcombine.low %v692_v39, %v695_v53  ;;  %v5306_v53 = vld [vmem:[%s3889_s14 + $0x5c] sm:$0x1] }
 0x112   : > { %2103 = vrot.lane.b32.xlu0 %v3537_v10, %s3854_s17  ;;  %v2850_v24 = vsel %vm2828_vm9, %v2817_v2, %v5061_v56  ;;  %v700_v3 = vrot.slane %v698_v29, 4  ;;  %v5251_v61 = vpop.permute.xlu1 %2623  ;;  %2197 = vrot.lane.b32.xlu1 %v3560_v43, %s3853_s16  ;;  %v699_v27 = vsel %vm3920_vm2, %v3345_v19, %v698_v29  ;;  %v1145_v40 = vshrl.u32 %v3382_v42, 16 }
 0x113   : > { %v758_v16 = vsel %vm3920_vm2, %v756_v22, %v757_v49  ;;  %v1148_v31 = vshll.u32 %v3382_v42, 16  ;;  %v2834_v47 = vsel %vm2828_vm9, %v2801_v41, %v5081_v63  ;;  %v953_v57 = vshrl.u32 %v5241_v35, 16 }
 0x114   : > { %v3561_v56 = vcombine.low %v755_v48, %v758_v16  ;;  %v702_v34 = vsel %vm3920_vm2, %v700_v3, %v701_v23  ;;  %v2852_v13 = vsel %vm2828_vm9, %v2819_v1, %v5090_v20  ;;  %v5271_v50 = vsel %vm2828_vm9, %v2803_v9, %v5104_v11  ;;  %v5275_v0 = vpop.permute.xlu0 %2607  ;;  %v5280_v20 = vld [vmem:[%s3889_s14 + $0xc4] sm:$0xf] }
 0x115   : > { %v1158_v63 = vshrl.u32 %v5249_v45, 16  ;;  %v956_v25 = vshll.u32 %v5241_v35, 16  ;;  %v3553_v32 = vcombine.low %v699_v27, %v702_v34  ;;  %v1147_v2 = vrot.slane %v1145_v40, 4 }
 0x116   : > { %2181 = vrot.lane.b32.xlu0 %v3552_v38, %s3853_s16  ;;  %v1150_v59 = vrot.slane %v1148_v31, 5  ;;  %v3576_v60 = vcombine.low %v3382_v42, %v5249_v45  ;;  %2199 = vrot.lane.b32.xlu1 %v3561_v56, %s3853_s16  ;;  %v955_v11 = vrot.slane %v953_v57, 4  ;;  %v966_v41 = vshrl.u32 %v5263_v28, 16  ;;  %v5301_v55 = vpop.permute.xlu1 %2701  ;;  %v5319_v31 = vld [vmem:[%s3889_s14 + $0xc8] sm:$0x1] }
 0x117   : > { %v1169_v51 = vshrl.u32 %v3384_v26, 16  ;;  %v1172_v6 = vshll.u32 %v3384_v26, 16  ;;  %v958_v17 = vrot.slane %v956_v25, 5  ;;  %v3568_v15 = vcombine.low %v5241_v35, %v5263_v28 }
 0x118   : > { %v5292_v39 = vsel %vm2861_vm10, %v2850_v24, %v5110_v7  ;;  %v5296_v5 = vsel %vm2861_vm10, %v2834_v47, %v5130_v14  ;;  %v1182_v43 = vshrl.u32 %v5280_v20, 16  ;;  %v3577_v52 = vcombine.low %v3384_v26, %v5280_v20  ;;  %v5314_v23 = vpop.permute.xlu0 %2685 }
 0x119   : > { %v977_v49 = vshrl.u32 %v3368_v33, 16  ;;  %v980_v10 = vshll.u32 %v3368_v33, 16  ;;  %v1171_v7 = vrot.slane %v1169_v51, 4  ;;  %v1174_v19 = vrot.slane %v1172_v6, 5  ;;  %v5334_v51 = vld [vmem:[%s3889_s14 + $0x68] sm:$0x1] }
 0x11a   : > { %2183 = vrot.lane.b32.xlu0 %v3553_v32, %s3853_s16  ;;  %v990_v29 = vshrl.u32 %v5286_v4, 16  ;;  %v3569_v14 = vcombine.low %v3368_v33, %v5286_v4  ;;  %2293 = vrot.lane.b32.xlu1 %v3576_v60, %s3852_s15  ;;  %v1151_v42 = vor.u32 %v1150_v59, %v1147_v2  ;;  %v1154_v1 = vshll.u32 %v5249_v45, 16 }
 0x11b   : > { %v1160_v48 = vrot.slane %v1158_v63, 4  ;;  %v1164_v22 = vshll.u32 %v5299_v54, 16  ;;  %v959_v35 = vor.u32 %v958_v17, %v955_v11  ;;  %v962_v9 = vshll.u32 %v5263_v28, 16 }
 0x11c   : > { %v968_v38 = vrot.slane %v966_v41, 4  ;;  %v972_v24 = vshll.u32 %v5306_v53, 16  ;;  %v979_v3 = vrot.slane %v977_v49, 4  ;;  %v982_v16 = vrot.slane %v980_v10, 5 }
 0x11d   : > { %v1152_v27 = vrot.slane %v1151_v42, 4  ;;  %v1156_v40 = vrot.slane %v1154_v1, 5  ;;  %v5324_v47 = vsel %vm2861_vm10, %v2852_v13, %v5137_v18  ;;  %v1166_v56 = vrot.slane %v1164_v22, 5  ;;  %v3416_v1 = vld [vmem:[%s3889_s14 + $0xb4] sm:$0xe] }
 0x11e   : > { %2277 = vrot.lane.b32.xlu0 %v3568_v15, %s3852_s15  ;;  %v960_v34 = vrot.slane %v959_v35, 4  ;;  %v964_v57 = vrot.slane %v962_v9, 5  ;;  %v5326_v26 = vpop.permute.xlu1 %2113  ;;  %2295 = vrot.lane.b32.xlu1 %v3577_v52, %s3852_s15  ;;  %v974_v25 = vrot.slane %v972_v24, 5  ;;  %v1175_v32 = vor.u32 %v1174_v19, %v1171_v7  ;;  %v3408_v9 = vld [vmem:[%s3889_s14 + $0x54] sm:$0xe] }
 0x11f   : > { %v1161_v63 = vor.u32 %v1160_v48, %v1156_v40  ;;  %v1178_v2 = vshll.u32 %v5280_v20, 16  ;;  %v1157_v59 = vsel %vm3978_vm5, %v1152_v27, %v1156_v40  ;;  %v1184_v33 = vrot.slane %v1182_v43, 4 }
 0x120   : > { %v969_v60 = vor.u32 %v968_v38, %v964_v57  ;;  %v1188_v18 = vshll.u32 %v5319_v31, 16  ;;  %v1176_v11 = vrot.slane %v1175_v32, 4  ;;  %v983_v6 = vor.u32 %v982_v16, %v979_v3 }
 0x121   : > { %v1162_v13 = vrot.slane %v1161_v63, 4  ;;  %v1180_v41 = vrot.slane %v1178_v2, 5  ;;  %v5336_v17 = vpop.permute.xlu0 %2097  ;;  %v965_v15 = vsel %vm3978_vm5, %v960_v34, %v964_v57  ;;  %v986_v43 = vshll.u32 %v5286_v4, 16 }
 0x122   : > { %2279 = vrot.lane.b32.xlu0 %v3569_v14, %s3852_s15  ;;  %v970_v52 = vrot.slane %v969_v60, 4  ;;  %v992_v49 = vrot.slane %v990_v29, 4  ;;  %v1190_v19 = vrot.slane %v1188_v18, 5  ;;  %v984_v42 = vrot.slane %v983_v6, 4  ;;  %v5349_v38 = vpop.permute.xlu1 %2703 }
 0x123   : > { %v1167_v10 = vsel %vm3978_vm5, %v1162_v13, %v1166_v56  ;;  %v1185_v7 = vor.u32 %v1184_v33, %v1180_v41  ;;  %v988_v35 = vrot.slane %v986_v43, 5  ;;  %v996_v14 = vshll.u32 %v5334_v51, 16 }
 0x124   : > { %v3592_v48 = vcombine.low %v1157_v59, %v1167_v10  ;;  %v975_v22 = vsel %vm3978_vm5, %v970_v52, %v974_v25  ;;  %v2869_v29 = vsel %vm2861_vm10, %v5271_v50, %v5147_v37  ;;  %v1181_v3 = vsel %vm3978_vm5, %v1176_v11, %v1180_v41  ;;  %v3417_v25 = vld [vmem:[%s3889_s14 + $0xc0] sm:$0xe] }
 0x125   : > { %v3584_v24 = vcombine.low %v965_v15, %v975_v22  ;;  %v1186_v16 = vrot.slane %v1185_v7, 4  ;;  %v989_v27 = vsel %vm3978_vm5, %v984_v42, %v988_v35  ;;  %v993_v40 = vor.u32 %v992_v49, %v988_v35  ;;  %v5365_v32 = vpop.permute.xlu0 %2687  ;;  %v3409_v11 = vld [vmem:[%s3889_s14 + $0x60] sm:$0xe] }
 0x126   : > { %2373 = vrot.lane.b32.xlu1 %v3592_v48, %s3855_s18  ;;  %v998_v56 = vrot.slane %v996_v14, 5  ;;  %v3432_v34 = vrot.slane %v3416_v1, 9  ;;  %v1356_v37 = vrot.slane %v5249_v45, 5  ;;  %v1359_v50 = vrot.slane %v5299_v54, 5  ;;  %v3462_v7 = vld [vmem:[%s3889_s14 + $0xc0] sm:$0xf] }
 0x127   : > { %2357 = vrot.lane.b32.xlu0 %v3584_v24, %s3855_s18  ;;  %v1191_v57 = vsel %vm3978_vm5, %v1186_v16, %v1190_v19  ;;  %v3424_v63 = vrot.slane %v3408_v9, 9  ;;  %v994_v59 = vrot.slane %v993_v40, 4  ;;  %v1300_v60 = vrot.slane %v5263_v28, 5  ;;  %v5398_v48 = vld [vmem:[%s3889_s14 + $0x60] sm:$0xf] }
 0x128   : > { %v3593_v2 = vcombine.low %v1181_v3, %v1191_v57  ;;  %v1303_v33 = vrot.slane %v5306_v53, 5  ;;  %v2916_v18 = vsel %vm2894_vm11, %v5292_v39, %v5163_v44  ;;  %v2900_v45 = vsel %vm2894_vm11, %v5296_v5, %v5176_v36  ;;  %v5417_v3 = vld [vmem:[%s3889_s14 + $0xc4] sm:$0xf]  ;;  %v3464_v40 = vld [vmem:[%s3889_s14 + $0xcc] sm:$0xf] }
 0x129   : > { %v1357_v54 = vsel %vm3920_vm2, %v3432_v34, %v1356_v37  ;;  %v1358_v13 = vrot.slane %v1356_v37, 4  ;;  %v999_v28 = vsel %vm3978_vm5, %v994_v59, %v998_v56  ;;  %v1301_v53 = vsel %vm3920_vm2, %v3424_v63, %v1300_v60  ;;  %v5432_v57 = vld [vmem:[%s3889_s14 + $0x6c] sm:$0xf] }
 0x12a   : > { %2375 = vrot.lane.b32.xlu1 %v3593_v2, %s3855_s18  ;;  %v1302_v41 = vrot.slane %v1300_v60, 4  ;;  %v3433_v44 = vrot.slane %v3417_v25, 9  ;;  %v3585_v36 = vcombine.low %v989_v27, %v999_v28  ;;  %v1363_v6 = vrot.slane %v5280_v20, 5  ;;  %v5440_v2 = vld [vmem:[%s3889_s14 + $0x64] sm:$0xf] }
 0x12b   : > { %v1360_v5 = vsel %vm3920_vm2, %v1358_v13, %v1359_v50  ;;  %v1366_v15 = vrot.slane %v5319_v31, 5  ;;  %v3425_v49 = vrot.slane %v3409_v11, 9  ;;  %v1307_v10 = vrot.slane %v5286_v4, 5 }
 0x12c   : > { %v5383_v39 = vpop.permute.xlu1 %2115  ;;  %v3608_v52 = vcombine.low %v1357_v54, %v1360_v5  ;;  %v1304_v43 = vsel %vm3920_vm2, %v1302_v41, %v1303_v33  ;;  %2359 = vrot.lane.b32.xlu0 %v3585_v36, %s3855_s18  ;;  %v1364_v42 = vsel %vm3920_vm2, %v3433_v44, %v1363_v6  ;;  %v1365_v1 = vrot.slane %v1363_v6, 4 }
 0x12d   : > { %v3600_v19 = vcombine.low %v1301_v53, %v1304_v43  ;;  %v1310_v20 = vrot.slane %v5334_v51, 5  ;;  %v2918_v4 = vsel %vm2894_vm11, %v5324_v47, %v5185_v8  ;;  %v2902_v22 = vsel %vm2894_vm11, %v2869_v29, %v5194_v46 }
 0x12e   : > { %2453 = vrot.lane.b32.xlu1 %v3608_v52, %s3856_s19  ;;  %v1308_v35 = vsel %vm3920_vm2, %v3425_v49, %v1307_v10  ;;  %v1309_v14 = vrot.slane %v1307_v10, 4  ;;  %v2949_v51 = vsel %vm2927_vm12, %v2916_v18, %v5208_v12  ;;  %v1367_v24 = vsel %vm3920_vm2, %v1365_v1, %v1366_v15 }
 0x12f   : > { %v5400_v31 = vpop.permute.xlu0 %2099  ;;  %v1754_v8 = vshrl.u32 %v3462_v7, 16  ;;  %v1757_v47 = vshll.u32 %v3462_v7, 16  ;;  %v2933_v46 = vsel %vm2927_vm12, %v2900_v45, %v5227_v58  ;;  %v3609_v29 = vcombine.low %v1364_v42, %v1367_v24  ;;  %v5451_v45 = vld [vmem:[%s3889_s14 + $0x70] sm:$0xf]  ;;  %v5476_v42 = vld [vmem:[%s3889_s14 + $0x68] sm:$0x1] }
 0x130   : > { %v5410_v9 = vpop.permute.xlu1 %2193  ;;  %v1311_v16 = vsel %vm3920_vm2, %v1309_v14, %v1310_v20  ;;  %v1562_v27 = vshrl.u32 %v5398_v48, 16  ;;  %2437 = vrot.lane.b32.xlu0 %v3600_v19, %s3856_s19  ;;  %v2951_v56 = vsel %vm2927_vm12, %v2918_v4, %v5251_v61  ;;  %v2935_v34 = vsel %vm2927_vm12, %v2902_v22, %v5275_v0  ;;  %v5445_v0 = vld [vmem:[%s3889_s14 + $0xd0] sm:$0xf] }
 0x131   : > { %v3601_v12 = vcombine.low %v1308_v35, %v1311_v16  ;;  %v1565_v58 = vshll.u32 %v5398_v48, 16  ;;  %v1756_v50 = vrot.slane %v1754_v8, 4  ;;  %v1767_v63 = vshrl.u32 %v5417_v3, 16 }
 0x132   : > { %2455 = vrot.lane.b32.xlu1 %v3609_v29, %s3856_s19  ;;  %v3624_v25 = vcombine.low %v3462_v7, %v5417_v3  ;;  %v2982_v61 = vsel %vm2960_vm14, %v2949_v51, %v5301_v55  ;;  %v1759_v59 = vrot.slane %v1757_v47, 5  ;;  %v2966_v60 = vsel %vm2960_vm14, %v2933_v46, %v5314_v23  ;;  %v5457_v55 = vld [vmem:[%s3889_s14 + $0xc8] sm:$0x1] }
 0x133   : > { %v5434_v37 = vpop.permute.xlu0 %2177  ;;  %v1778_v33 = vshrl.u32 %v3464_v40, 16  ;;  %v1781_v18 = vshll.u32 %v3464_v40, 16  ;;  %3725 = vmatprep.mubr.msk.bf16.mxu1 %vm3013_vm15, %v2982_v61  ;;  %v1564_v54 = vrot.slane %v1562_v27, 4  ;;  %v1567_v13 = vrot.slane %v1565_v58, 5  ;;  %3709 = vmatprep.mubr.msk.bf16.mxu0 %vm3013_vm15, %v2966_v60  ;;  %v5489_v27 = vld [vmem:[%s3889_s14 + $0xd4] sm:$0x1] }
 0x134   : > { %v1586_v11 = vshrl.u32 %v5432_v57, 16  ;;  %v1589_v28 = vshll.u32 %v5432_v57, 16  ;;  %2439 = vrot.lane.b32.xlu0 %v3601_v12, %s3856_s19  ;;  %v1575_v23 = vshrl.u32 %v5440_v2, 16  ;;  %v3616_v41 = vcombine.low %v5398_v48, %v5440_v2 }
 0x135   : > { %v5459_v53 = vpop.permute.xlu1 %2195  ;;  %v1791_v44 = vshrl.u32 %v5445_v0, 16  ;;  %v3625_v36 = vcombine.low %v3464_v40, %v5445_v0  ;;  %v1780_v6 = vrot.slane %v1778_v33, 4  ;;  %v1783_v15 = vrot.slane %v1781_v18, 5 }
 0x136   : > { %2549 = vrot.lane.b32.xlu1 %v3624_v25, %s3857_s20  ;;  %v1599_v52 = vshrl.u32 %v5451_v45, 16  ;;  %v3617_v43 = vcombine.low %v5432_v57, %v5451_v45  ;;  %v1760_v49 = vor.u32 %v1759_v59, %v1756_v50  ;;  %v1763_v10 = vshll.u32 %v5417_v3, 16 }
 0x137   : > { %v5467_v5 = vpop.permute.xlu0 %2179  ;;  %v1769_v7 = vrot.slane %v1767_v63, 4  ;;  %v1773_v19 = vshll.u32 %v5457_v55, 16  ;;  %v1588_v1 = vrot.slane %v1586_v11, 4  ;;  %v1591_v20 = vrot.slane %v1589_v28, 5 }
 0x138   : > { %v1568_v48 = vor.u32 %v1567_v13, %v1564_v54  ;;  %v1571_v4 = vshll.u32 %v5440_v2, 16  ;;  %2533 = vrot.lane.b32.xlu0 %v3616_v41, %s3857_s20  ;;  %v1761_v35 = vrot.slane %v1760_v49, 4  ;;  %v1765_v14 = vrot.slane %v1763_v10, 5 }
 0x139   : > { %v5479_v22 = vpop.permute.xlu1 %2289  ;;  %v1775_v51 = vrot.slane %v1773_v19, 5  ;;  %v1577_v24 = vrot.slane %v1575_v23, 4  ;;  %v1581_v29 = vshll.u32 %v5476_v42, 16  ;;  %v2984_v16 = vsel %vm2960_vm14, %v2951_v56, %v5349_v38  ;;  %v5500_v38 = vld [vmem:[%s3889_s14 + $0x74] sm:$0x1] }
 0x13a   : > { %2551 = vrot.lane.b32.xlu1 %v3625_v36, %s3857_s20  ;;  %v1569_v47 = vrot.slane %v1568_v48, 4  ;;  %v1573_v46 = vrot.slane %v1571_v4, 5  ;;  %v1766_v40 = vsel %vm3978_vm5, %v1761_v35, %v1765_v14  ;;  %v1770_v12 = vor.u32 %v1769_v7, %v1765_v14  ;;  %3726 = vmatmul.mubr.msk.bf16.gmra.mxu1 %vm3013_vm15, %v2984_v16  ;;  %v3496_v36 = vld [vmem:[%s3889_s14 + $0xc0] sm:$0xe] }
 0x13b   : > { %v5482_v8 = vpop.permute.xlu0 %2273  ;;  %v2968_v58 = vsel %vm2960_vm14, %v2935_v34, %v5365_v32  ;;  %v1784_v57 = vor.u32 %v1783_v15, %v1780_v6  ;;  %v1583_v25 = vrot.slane %v1581_v29, 5  ;;  %v1787_v61 = vshll.u32 %v5445_v0, 16  ;;  %v3488_v19 = vld [vmem:[%s3889_s14 + $0x60] sm:$0xe]  ;;  %v3497_v29 = vld [vmem:[%s3889_s14 + $0xcc] sm:$0xe] }
 0x13c   : > { %v1574_v50 = vsel %vm3978_vm5, %v1569_v47, %v1573_v46  ;;  %v1578_v63 = vor.u32 %v1577_v24, %v1573_v46  ;;  %3710 = vmatmul.mubr.msk.bf16.gmra.mxu0 %vm3013_vm15, %v2968_v58  ;;  %2535 = vrot.lane.b32.xlu0 %v3617_v43, %s3857_s20  ;;  %v1771_v56 = vrot.slane %v1770_v12, 4  ;;  %v1793_v32 = vrot.slane %v1791_v44, 4 }
 0x13d   : > { %v1785_v59 = vrot.slane %v1784_v57, 4  ;;  %v1797_v34 = vshll.u32 %v5489_v27, 16  ;;  %v5505_v60 = vpop.permute.xlu1 %2291  ;;  %v1789_v18 = vrot.slane %v1787_v61, 5  ;;  %v1592_v54 = vor.u32 %v1591_v20, %v1588_v1 }
 0x13e   : > { %v1579_v33 = vrot.slane %v1578_v63, 4  ;;  %v1595_v13 = vshll.u32 %v5451_v45, 16  ;;  %v1776_v28 = vsel %vm3978_vm5, %v1771_v56, %v1775_v51  ;;  %v1601_v23 = vrot.slane %v1599_v52, 4 }
 0x13f   : > { %v5508_v11 = vpop.permute.xlu0 %2275  ;;  %v1605_v41 = vshll.u32 %v5500_v38, 16  ;;  %v3640_v44 = vcombine.low %v1766_v40, %v1776_v28  ;;  %v1794_v15 = vor.u32 %v1793_v32, %v1789_v18  ;;  %v1799_v43 = vrot.slane %v1797_v34, 5 }
 0x140   : > { %v1584_v6 = vsel %vm3978_vm5, %v1579_v33, %v1583_v25  ;;  %v1593_v10 = vrot.slane %v1592_v54, 4  ;;  %v1597_v7 = vrot.slane %v1595_v13, 5  ;;  %v1790_v1 = vsel %vm3978_vm5, %v1785_v59, %v1789_v18 }
 0x141   : > { %v3632_v49 = vcombine.low %v1574_v50, %v1584_v6  ;;  %2629 = vrot.lane.b32.xlu1 %v3640_v44, %s3858_s21  ;;  %v1795_v52 = vrot.slane %v1794_v15, 4  ;;  %v3512_v20 = vrot.slane %v3496_v36, 9  ;;  %v1607_v4 = vrot.slane %v1605_v41, 5  ;;  %v3489_v50 = vld [vmem:[%s3889_s14 + $0x6c] sm:$0xe] }
 0x142   : > { %v1602_v48 = vor.u32 %v1601_v23, %v1597_v7  ;;  %v1965_v35 = vrot.slane %v5417_v3, 5  ;;  %v1968_v14 = vrot.slane %v5457_v55, 5  ;;  %v1598_v47 = vsel %vm3978_vm5, %v1593_v10, %v1597_v7 }
 0x143   : > { %2613 = vrot.lane.b32.xlu0 %v3632_v49, %s3858_s21  ;;  %v1800_v24 = vsel %vm3978_vm5, %v1795_v52, %v1799_v43  ;;  %v3504_v46 = vrot.slane %v3488_v19, 9  ;;  %v1909_v55 = vrot.slane %v5440_v2, 5  ;;  %v1912_v57 = vrot.slane %v5476_v42, 5 }
 0x144   : > { %v5523_v51 = vpop.permute.xlu1 %2369  ;;  %v3641_v40 = vcombine.low %v1790_v1, %v1800_v24  ;;  %v1603_v12 = vrot.slane %v1602_v48, 4  ;;  %v1966_v58 = vsel %vm3920_vm2, %v3512_v20, %v1965_v35  ;;  %v1967_v3 = vrot.slane %v1965_v35, 4  ;;  %v3829_v20 = vld [vmem:[%s3889_s14 + $0x90] sm:$0xf]  ;;  %v3830_v48 = vld [vmem:[%s3889_s14 + $0x94] sm:$0xf] }
 0x145   : > { %v5530_v16 = vpop.permute.xlu0 %2353  ;;  %v3513_v61 = vrot.slane %v3497_v29, 9  ;;  %v1972_v56 = vrot.slane %v5445_v0, 5  ;;  %v1910_v34 = vsel %vm3920_vm2, %v3504_v46, %v1909_v55  ;;  %v1911_v2 = vrot.slane %v1909_v55, 4 }
 0x146   : > { %2631 = vrot.lane.b32.xlu1 %v3641_v40, %s3858_s21  ;;  %v1608_v63 = vsel %vm3978_vm5, %v1603_v12, %v1607_v4  ;;  %v1969_v25 = vsel %vm3920_vm2, %v1967_v3, %v1968_v14  ;;  %v1975_v18 = vrot.slane %v5489_v27, 5  ;;  %v3505_v30 = vrot.slane %v3489_v50, 9  ;;  %v3832_v14 = vld [vmem:[%s3889_s14 + $0x34] sm:$0xf] }
 0x147   : > { %v3633_v59 = vcombine.low %v1598_v47, %v1608_v63  ;;  %v3656_v32 = vcombine.low %v1966_v58, %v1969_v25  ;;  %v1973_v42 = vsel %vm3920_vm2, %v3513_v61, %v1972_v56  ;;  %v1974_v33 = vrot.slane %v1972_v56, 4  ;;  %v3834_v61 = vld [vmem:[%s3889_s14 + $0xa0] sm:$0xf] }
 0x148   : > { %v1913_v0 = vsel %vm3920_vm2, %v1911_v2, %v1912_v57  ;;  %v1916_v13 = vrot.slane %v5451_v45, 5  ;;  %v1919_v28 = vrot.slane %v5500_v38, 5  ;;  %v3526_v4 = vcombine.low %v3829_v20, %v3830_v48  ;;  %v3835_v2 = vld [vmem:[%s3889_s14 + $0x3c] sm:$0xf] }
 0x149   : > { %2615 = vrot.lane.b32.xlu0 %v3633_v59, %s3858_s21  ;;  %v3648_v41 = vcombine.low %v1910_v34, %v1913_v0  ;;  %v1976_v27 = vsel %vm3920_vm2, %v1974_v33, %v1975_v18  ;;  %v3518_v24 = vcombine.low %v3831_v21, %v3832_v14 }
 0x14a   : > { %v5548_v54 = vpop.permute.xlu1 %2371  ;;  %2709 = vrot.lane.b32.xlu1 %v3656_v32, %s3859_s22  ;;  %v3657_v36 = vcombine.low %v1973_v42, %v1976_v27  ;;  %v1917_v44 = vsel %vm3920_vm2, %v3505_v30, %v1916_v13  ;;  %v1918_v6 = vrot.slane %v1916_v13, 4  ;;  %v2752_v46 = vsel %vm2713_vm6, %v3526_v4, %v5326_v26  ;;  %v3836_v42 = vld [vmem:[%s3889_s14 + $0x40] sm:$0xf] }
 0x14b   : > { %v5555_v23 = vpop.permute.xlu0 %2355  ;;  %v2788_v29 = vsel %vm2762_vm7, %v2752_v46, %v5410_v9  ;;  %v2728_v58 = vsel %vm2713_vm6, %v3518_v24, %v5336_v17  ;;  %v3519_v33 = vcombine.low %v3835_v2, %v3836_v42  ;;  %v3839_v42 = vld [vmem:[%s3889_s14 + $0x48] sm:$0xf] }
 0x14c   : > { %v1920_v45 = vsel %vm3920_vm2, %v1918_v6, %v1919_v28  ;;  %v2821_v40 = vsel %vm2795_vm8, %v2788_v29, %v5479_v22  ;;  %v2772_v55 = vsel %vm2762_vm7, %v2728_v58, %v5434_v37 }
 0x14d   : > { %2693 = vrot.lane.b32.xlu0 %v3648_v41, %s3859_s22  ;;  %v3649_v43 = vcombine.low %v1917_v44, %v1920_v45  ;;  %v2854_v3 = vsel %vm2828_vm9, %v2821_v40, %v5523_v51  ;;  %v2805_v9 = vsel %vm2795_vm8, %v2772_v55, %v5482_v8  ;;  %v3833_v8 = vld [vmem:[%s3889_s14 + $0x9c] sm:$0xf]  ;;  %v2731_v28 = vsel %vm2713_vm6, %v3519_v33, %v5400_v31  ;;  %v3840_v33 = vld [vmem:[%s3889_s14 + $0x4c] sm:$0xf] }
 0x14e   : > { %v2450_v15 = vpop.permute.xlu1 %2449  ;;  %2711 = vrot.lane.b32.xlu1 %v3657_v36, %s3859_s22  ;;  %v2838_v50 = vsel %vm2828_vm9, %v2805_v9, %v5530_v16  ;;  %v3527_v56 = vcombine.low %v3833_v8, %v3834_v61  ;;  %v3837_v61 = vld [vmem:[%s3889_s14 + $0xa8] sm:$0xf] }
 0x14f   : > { %v2434_v38 = vpop.permute.xlu0 %2433  ;;  %v2887_v26 = vsel %vm2861_vm10, %v2854_v3, %v2450_v15 }
 0x150   : > { %v2871_v51 = vsel %vm2861_vm10, %v2838_v50, %v2434_v38  ;;  %v2755_v34 = vsel %vm2713_vm6, %v3527_v56, %v5383_v39  ;;  %v2774_v39 = vsel %vm2762_vm7, %v2731_v28, %v5467_v5  ;;  %v3838_v56 = vld [vmem:[%s3889_s14 + $0xac] sm:$0xf]  ;;  %v3841_v28 = vld [vmem:[%s3889_s14 + $0xb4] sm:$0xf] }
 0x151   : > { %2695 = vrot.lane.b32.xlu0 %v3649_v43, %s3859_s22  ;;  %v2790_v18 = vsel %vm2762_vm7, %v2755_v34, %v5459_v53  ;;  %v2807_v53 = vsel %vm2795_vm8, %v2774_v39, %v5508_v11 }
 0x152   : > { %v2452_v49 = vpop.permute.xlu1 %2451  ;;  %v2823_v30 = vsel %vm2795_vm8, %v2790_v18, %v5505_v60  ;;  %v3520_v18 = vcombine.low %v3839_v42, %v3840_v33 }
 0x153   : > { %v2436_v10 = vpop.permute.xlu0 %2435  ;;  %v2856_v13 = vsel %vm2828_vm9, %v2823_v30, %v5548_v54  ;;  %v2840_v54 = vsel %vm2828_vm9, %v2807_v53, %v5555_v23 }
 0x154   : > { %v2889_v41 = vsel %vm2861_vm10, %v2856_v13, %v2452_v49  ;;  %v2873_v6 = vsel %vm2861_vm10, %v2840_v54, %v2436_v10  ;;  %v3843_v54 = vld [vmem:[%s3889_s14 + $0x54] sm:$0xf] }
 0x156   : > { %v2546_v7 = vpop.permute.xlu1 %2545 }
 0x157   : > { %v2530_v19 = vpop.permute.xlu0 %2529  ;;  %v2920_v57 = vsel %vm2894_vm11, %v2887_v26, %v2546_v7 }
 0x158   : > { %v2904_v25 = vsel %vm2894_vm11, %v2871_v51, %v2530_v19 }
 0x15a   : > { %v2548_v1 = vpop.permute.xlu1 %2547 }
 0x15b   : > { %v2532_v52 = vpop.permute.xlu0 %2531  ;;  %v2922_v27 = vsel %vm2894_vm11, %v2889_v41, %v2548_v1  ;;  %v3842_v41 = vld [vmem:[%s3889_s14 + $0xb8] sm:$0xf] }
 0x15c   : > { %v2906_v5 = vsel %vm2894_vm11, %v2873_v6, %v2532_v52  ;;  %v3529_v39 = vcombine.low %v3841_v28, %v3842_v41 }
 0x161   : > { %v2626_v35 = vpop.permute.xlu1 %2625 }
 0x162   : > { %v2610_v47 = vpop.permute.xlu0 %2609  ;;  %v2953_v17 = vsel %vm2927_vm12, %v2920_v57, %v2626_v35 }
 0x163   : > { %v2937_v59 = vsel %vm2927_vm12, %v2904_v25, %v2610_v47 }
 0x166   : > { %v2628_v12 = vpop.permute.xlu1 %2627 }
 0x167   : > { %v2955_v60 = vsel %vm2927_vm12, %v2922_v27, %v2628_v12 }
 0x169   : > { %v2612_v22 = vpop.permute.xlu0 %2611 }
 0x16a   : > { %v2706_v63 = vpop.permute.xlu1 %2705  ;;  %v2939_v15 = vsel %vm2927_vm12, %v2906_v5, %v2612_v22 }
 0x16b   : > { %v2986_v37 = vsel %vm2960_vm14, %v2953_v17, %v2706_v63 }
 0x16c   : > { %3729 = vmatprep.mubr.msk.bf16.mxu1 %vm3013_vm15, %v2986_v37 }
 0x16d   : > { %v2690_v32 = vpop.permute.xlu0 %2689 }
 0x16e   : > { %v2970_v16 = vsel %vm2960_vm14, %v2937_v59, %v2690_v32  ;;  %v3528_v59 = vcombine.low %v3837_v61, %v3838_v56 }
 0x16f   : > { %3713 = vmatprep.mubr.msk.bf16.mxu0 %vm3013_vm15, %v2970_v16 }
 0x173   : > { %v5607_v0 = vpop.permute.xlu1 %2117 }
 0x174   : > { %v2758_v13 = vsel %vm2713_vm6, %v3528_v59, %v5607_v0 }
 0x177   : > { %v5620_v36 = vpop.permute.xlu0 %2101  ;;  %v2708_v44 = vpop.permute.xlu1 %2707 }
 0x178   : > { %v2988_v31 = vsel %vm2960_vm14, %v2955_v60, %v2708_v44  ;;  %v2734_v44 = vsel %vm2713_vm6, %v3520_v18, %v5620_v36 }
 0x179   : > { %3730 = vmatmul.mubr.msk.bf16.gmra.mxu1 %vm3013_vm15, %v2988_v31  ;;  %v3521_v31 = vcombine.low %v3843_v54, %v5167_v62 }
 0x17b   : > { %v2692_v45 = vpop.permute.xlu0 %2691 }
 0x17c   : > { %v2972_v11 = vsel %vm2960_vm14, %v2939_v15, %v2692_v45 }
 0x17d   : > { %3714 = vmatmul.mubr.msk.bf16.gmra.mxu0 %vm3013_vm15, %v2972_v11 }
 0x180   : > { %v5631_v38 = vpop.permute.xlu1 %2119 }
 0x181   : > { %v2761_v5 = vsel %vm2713_vm6, %v3529_v39, %v5631_v38 }
 0x184   : > { %v5633_v43 = vpop.permute.xlu0 %2103  ;;  %v2198_v23 = vpop.permute.xlu1 %2197 }
 0x185   : > { %v2792_v27 = vsel %vm2762_vm7, %v2758_v13, %v2198_v23 }
 0x188   : > { %v5635_v49 = vpop.permute.xlu0 %2181  ;;  %v5637_v10 = vpop.permute.xlu1 %2199 }
 0x189   : > { %v2776_v0 = vsel %vm2762_vm7, %v2734_v44, %v5635_v49  ;;  %v2794_v45 = vsel %vm2762_vm7, %v2761_v5, %v5637_v10 }
 0x18c   : > { %v5639_v7 = vpop.permute.xlu0 %2183  ;;  %v2294_v19 = vpop.permute.xlu1 %2293 }
 0x18d   : > { %v2825_v53 = vsel %vm2795_vm8, %v2792_v27, %v2294_v19 }
 0x190   : > { %v5641_v1 = vpop.permute.xlu0 %2277  ;;  %v5643_v52 = vpop.permute.xlu1 %2295 }
 0x191   : > { %v2809_v11 = vsel %vm2795_vm8, %v2776_v0, %v5641_v1  ;;  %v2827_v62 = vsel %vm2795_vm8, %v2794_v45, %v5643_v52 }
 0x194   : > { %v5645_v20 = vpop.permute.xlu0 %2279 }
 0x198   : > { %v2374_v48 = vpop.permute.xlu1 %2373 }
 0x199   : > { %v5647_v4 = vpop.permute.xlu0 %2357  ;;  %v2858_v6 = vsel %vm2828_vm9, %v2825_v53, %v2374_v48  ;;  %v2737_v48 = vsel %vm2713_vm6, %v3521_v31, %v5633_v43 }
 0x19a   : > { %v2842_v38 = vsel %vm2828_vm9, %v2809_v11, %v5647_v4  ;;  %v2778_v52 = vsel %vm2762_vm7, %v2737_v48, %v5639_v7 }
 0x19b   : > { %v2811_v43 = vsel %vm2795_vm8, %v2778_v52, %v5645_v20 }
 0x19c   : > { %v5649_v35 = vpop.permute.xlu1 %2375 }
 0x19d   : > { %v2860_v10 = vsel %vm2828_vm9, %v2827_v62, %v5649_v35 }
 0x19e   : > { %v5651_v21 = vpop.permute.xlu0 %2359 }
 0x19f   : > { %v2844_v7 = vsel %vm2828_vm9, %v2811_v43, %v5651_v21 }
 0x1a0   : > { %v2454_v14 = vpop.permute.xlu1 %2453 }
 0x1a1   : > { %v2891_v15 = vsel %vm2861_vm10, %v2858_v6, %v2454_v14 }
 0x1a2   : > { %v5653_v24 = vpop.permute.xlu0 %2437 }
 0x1a3   : > { %v2875_v1 = vsel %vm2861_vm10, %v2842_v38, %v5653_v24 }
 0x1a4   : > { %v5655_v47 = vpop.permute.xlu1 %2455 }
 0x1a5   : > { %v2893_v4 = vsel %vm2861_vm10, %v2860_v10, %v5655_v47 }
 0x1a6   : > { %v5657_v46 = vpop.permute.xlu0 %2439 }
 0x1a8   : > { %v2550_v29 = vpop.permute.xlu1 %2549 }
 0x1a9   : > { %v2924_v36 = vsel %vm2894_vm11, %v2891_v15, %v2550_v29 }
 0x1aa   : > { %v5660_v40 = vpop.permute.xlu0 %2533 }
 0x1ab   : > { %v2908_v29 = vsel %vm2894_vm11, %v2875_v1, %v5660_v40 }
 0x1ac   : > { %v5667_v55 = vpop.permute.xlu1 %2551 }
 0x1ad   : > { %v3707_v12 = vpop.f32.mrf.mxu0  ;;  %v3723_v3 = vpop.f32.mrf.mxu1  ;;  %v2926_v35 = vsel %vm2894_vm11, %v2893_v4, %v5667_v55 }
 0x1ae   : > { %v3213_v58 = vmax.f32 %v3707_v12, 0.0  ;;  %v3229_v26 = vmax.f32 %v3723_v3, 0.0  ;;  %v5671_v50 = vpop.permute.xlu0 %2535  ;;  %v2877_v3 = vsel %vm2861_vm10, %v2844_v7, %v5657_v46 }
 0x1af   : > { %v3084_v9 = vpop.f32.mrf.mxu0  ;;  %v3148_v22 = vpop.f32.mrf.mxu1  ;;  %v2910_v55 = vsel %vm2894_vm11, %v2877_v3, %v5671_v50 }
 0x1b0   : > { %3245 = vst.msk [vmem:[%s5665_s4 + $0x10] sm:$0xff] %vm2762_vm7, %v3213_v58  ;;  %v3211_v57 = vmax.f32 %v3084_v9, 0.0  ;;  %3261 = vst.msk [vmem:[%s5665_s4 + $0x90] sm:$0xff] %vm2762_vm7, %v3229_v26  ;;  %v3227_v17 = vmax.f32 %v3148_v22, 0.0 }
 0x1b1   : > { %v3708_v63 = vpop.f32.mrf.mxu0  ;;  %v3724_v37 = vpop.f32.mrf.mxu1 }
 0x1b2   : > { %3243 = vst.msk [vmem:[%s5665_s4] sm:$0xff] %vm2762_vm7, %v3211_v57  ;;  %v3214_v51 = vmax.f32 %v3708_v63, 0.0  ;;  %3259 = vst.msk [vmem:[%s5665_s4 + $0x80] sm:$0xff] %vm2762_vm7, %v3227_v17  ;;  %v3230_v25 = vmax.f32 %v3724_v37, 0.0 }
 0x1b3   : > { %v3087_v8 = vpop.f32.mrf.mxu0  ;;  %v3151_v16 = vpop.f32.mrf.mxu1 }
 0x1b4   : > { %3246 = vst.msk [vmem:[%s5665_s4 + $0x18] sm:$0xff] %vm2762_vm7, %v3214_v51  ;;  %v3212_v32 = vmax.f32 %v3087_v8, 0.0  ;;  %v2630_v34 = vpop.permute.xlu1 %2629  ;;  %3262 = vst.msk [vmem:[%s5665_s4 + $0x98] sm:$0xff] %vm2762_vm7, %v3230_v25  ;;  %v3228_v2 = vmax.f32 %v3151_v16, 0.0 }
 0x1b5   : > { %v2614_v30 = vpop.permute.xlu0 %2613  ;;  %v2957_v19 = vsel %vm2927_vm12, %v2924_v36, %v2630_v34 }
 0x1b6   : > { %3244 = vst.msk [vmem:[%s5665_s4 + $0x8] sm:$0xff] %vm2762_vm7, %v3212_v32  ;;  %3260 = vst.msk [vmem:[%s5665_s4 + $0x88] sm:$0xff] %vm2762_vm7, %v3228_v2  ;;  %v2941_v24 = vsel %vm2927_vm12, %v2908_v29, %v2614_v30 }
 0x1b8   : > { %v2632_v60 = vpop.permute.xlu1 %2631 }
 0x1b9   : > { %v2959_v58 = vsel %vm2927_vm12, %v2926_v35, %v2632_v60 }
 0x1bb   : > { %v2616_v23 = vpop.permute.xlu0 %2615 }
 0x1bc   : > { %v2710_v49 = vpop.permute.xlu1 %2709  ;;  %v2943_v21 = vsel %vm2927_vm12, %v2910_v55, %v2616_v23 }
 0x1bd   : > { %v2990_v14 = vsel %vm2960_vm14, %v2957_v19, %v2710_v49 }
 0x1be   : > { %3733 = vmatprep.mubr.msk.bf16.mxu1 %vm3013_vm15, %v2990_v14 }
 0x1bf   : > { %v2694_v12 = vpop.permute.xlu0 %2693 }
 0x1c0   : > { %v2974_v47 = vsel %vm2960_vm14, %v2941_v24, %v2694_v12  ;;  %v2712_v40 = vpop.permute.xlu1 %2711 }
 0x1c1   : > { %3717 = vmatprep.mubr.msk.bf16.mxu0 %vm3013_vm15, %v2974_v47  ;;  %v2992_v20 = vsel %vm2960_vm14, %v2959_v58, %v2712_v40 }
 0x1c2   : > { %3734 = vmatmul.mubr.msk.bf16.gmra.mxu1 %vm3013_vm15, %v2992_v20 }
 0x1c3   : > { %v2696_v26 = vpop.permute.xlu0 %2695 }
 0x1c4   : > { %v2976_v9 = vsel %vm2960_vm14, %v2943_v21, %v2696_v26 }
 0x1c5   : > { %3718 = vmatmul.mubr.msk.bf16.gmra.mxu0 %vm3013_vm15, %v2976_v9 }
 0x1fa   : > { %v3727_v46 = vpop.f32.mrf.mxu1 }
 0x1fb   : > { %v3233_v22 = vmax.f32 %v3727_v46, 0.0 }
 0x1fc   : > { %v3711_v57 = vpop.f32.mrf.mxu0  ;;  %v3164_v63 = vpop.f32.mrf.mxu1 }
 0x1fd   : > { %v3217_v17 = vmax.f32 %v3711_v57, 0.0  ;;  %3265 = vst.msk [vmem:[%s5665_s4 + $0xb0] sm:$0xff] %vm2762_vm7, %v3233_v22  ;;  %v3231_v51 = vmax.f32 %v3164_v63, 0.0 }
 0x1fe   : > { %v3100_v50 = vpop.f32.mrf.mxu0  ;;  %v3728_v25 = vpop.f32.mrf.mxu1 }
 0x1ff   : > { %3249 = vst.msk [vmem:[%s5665_s4 + $0x30] sm:$0xff] %vm2762_vm7, %v3217_v17  ;;  %v3215_v37 = vmax.f32 %v3100_v50, 0.0  ;;  %3263 = vst.msk [vmem:[%s5665_s4 + $0xa0] sm:$0xff] %vm2762_vm7, %v3231_v51  ;;  %v3234_v61 = vmax.f32 %v3728_v25, 0.0 }
 0x200   : > { %v3712_v8 = vpop.f32.mrf.mxu0  ;;  %v3167_v59 = vpop.f32.mrf.mxu1 }
 0x201   : > { %3247 = vst.msk [vmem:[%s5665_s4 + $0x20] sm:$0xff] %vm2762_vm7, %v3215_v37  ;;  %v3218_v56 = vmax.f32 %v3712_v8, 0.0  ;;  %3266 = vst.msk [vmem:[%s5665_s4 + $0xb8] sm:$0xff] %vm2762_vm7, %v3234_v61  ;;  %v3232_v16 = vmax.f32 %v3167_v59, 0.0 }
 0x202   : > { %v3103_v32 = vpop.f32.mrf.mxu0 }
 0x203   : > { %3250 = vst.msk [vmem:[%s5665_s4 + $0x38] sm:$0xff] %vm2762_vm7, %v3218_v56  ;;  %v3216_v34 = vmax.f32 %v3103_v32, 0.0  ;;  %3264 = vst.msk [vmem:[%s5665_s4 + $0xa8] sm:$0xff] %vm2762_vm7, %v3232_v16 }
 0x205   : > { %3248 = vst.msk [vmem:[%s5665_s4 + $0x28] sm:$0xff] %vm2762_vm7, %v3216_v34 }
 0x239   : > { %v3731_v2 = vpop.f32.mrf.mxu1 }
 0x23a   : > { %v3237_v42 = vmax.f32 %v3731_v2, 0.0 }
 0x23b   : > { %v3180_v33 = vpop.f32.mrf.mxu1 }
 0x23c   : > { %3269 = vst.msk [vmem:[%s5665_s4 + $0xd0] sm:$0xff] %vm2762_vm7, %v3237_v42  ;;  %v3235_v18 = vmax.f32 %v3180_v33, 0.0 }
 0x23d   : > { %v3715_v30 = vpop.f32.mrf.mxu0  ;;  %v3732_v13 = vpop.f32.mrf.mxu1 }
 0x23e   : > { %v3221_v28 = vmax.f32 %v3715_v30, 0.0  ;;  %3267 = vst.msk [vmem:[%s5665_s4 + $0xc0] sm:$0xff] %vm2762_vm7, %v3235_v18  ;;  %v3238_v41 = vmax.f32 %v3732_v13, 0.0 }
 0x23f   : > { %v3116_v39 = vpop.f32.mrf.mxu0  ;;  %v3183_v27 = vpop.f32.mrf.mxu1 }
 0x240   : > { %3253 = vst.msk [vmem:[%s5665_s4 + $0x50] sm:$0xff] %vm2762_vm7, %v3221_v28  ;;  %v3219_v53 = vmax.f32 %v3116_v39, 0.0  ;;  %3270 = vst.msk [vmem:[%s5665_s4 + $0xd8] sm:$0xff] %vm2762_vm7, %v3238_v41  ;;  %v3236_v60 = vmax.f32 %v3183_v27, 0.0 }
 0x241   : > { %v3716_v44 = vpop.f32.mrf.mxu0 }
 0x242   : > { %3251 = vst.msk [vmem:[%s5665_s4 + $0x40] sm:$0xff] %vm2762_vm7, %v3219_v53  ;;  %v3222_v54 = vmax.f32 %v3716_v44, 0.0  ;;  %3268 = vst.msk [vmem:[%s5665_s4 + $0xc8] sm:$0xff] %vm2762_vm7, %v3236_v60 }
 0x243   : > { %v3119_v31 = vpop.f32.mrf.mxu0 }
 0x244   : > { %3254 = vst.msk [vmem:[%s5665_s4 + $0x58] sm:$0xff] %vm2762_vm7, %v3222_v54  ;;  %v3220_v6 = vmax.f32 %v3119_v31, 0.0 }
 0x246   : > { %3252 = vst.msk [vmem:[%s5665_s4 + $0x48] sm:$0xff] %vm2762_vm7, %v3220_v6 }
 0x282   : > { %v3735_v5 = vpop.f32.mrf.mxu1 }
 0x283   : > { %v3241_v0 = vmax.f32 %v3735_v5, 0.0 }
 0x284   : > { %v3196_v15 = vpop.f32.mrf.mxu1 }
 0x285   : > { %v3719_v45 = vpop.f32.mrf.mxu0  ;;  %3273 = vst.msk [vmem:[%s5665_s4 + $0xf0] sm:$0xff] %vm2762_vm7, %v3241_v0  ;;  %v3239_v11 = vmax.f32 %v3196_v15, 0.0 }
 0x286   : > { %v3225_v36 = vmax.f32 %v3719_v45, 0.0  ;;  %v3736_v23 = vpop.f32.mrf.mxu1 }
 0x287   : > { %v3132_v62 = vpop.f32.mrf.mxu0  ;;  %3271 = vst.msk [vmem:[%s5665_s4 + $0xe0] sm:$0xff] %vm2762_vm7, %v3239_v11  ;;  %v3242_v38 = vmax.f32 %v3736_v23, 0.0 }
 0x288   : > { %3257 = vst.msk [vmem:[%s5665_s4 + $0x70] sm:$0xff] %vm2762_vm7, %v3225_v36  ;;  %v3223_v19 = vmax.f32 %v3132_v62, 0.0  ;;  %v3199_v49 = vpop.f32.mrf.mxu1 }
 0x289   : > { %v3720_v48 = vpop.f32.mrf.mxu0  ;;  %3274 = vst.msk [vmem:[%s5665_s4 + $0xf8] sm:$0xff] %vm2762_vm7, %v3242_v38  ;;  %v3240_v10 = vmax.f32 %v3199_v49, 0.0 }
 0x28a   : > { %3255 = vst.msk [vmem:[%s5665_s4 + $0x60] sm:$0xff] %vm2762_vm7, %v3223_v19  ;;  %v3226_v1 = vmax.f32 %v3720_v48, 0.0 }
 0x28b   : > { %v3135_v14 = vpop.f32.mrf.mxu0  ;;  %3272 = vst.msk [vmem:[%s5665_s4 + $0xe8] sm:$0xff] %vm2762_vm7, %v3240_v10 }
 0x28c   : > { %3258 = vst.msk [vmem:[%s5665_s4 + $0x78] sm:$0xff] %vm2762_vm7, %v3226_v1  ;;  %v3224_v52 = vmax.f32 %v3135_v14, 0.0 }
 0x28e   : > { %3256 = vst.msk [vmem:[%s5665_s4 + $0x68] sm:$0xff] %vm2762_vm7, %v3224_v52 }
 0x28f PF: > { %s12_s9 = sadd.s32 1, %s3850_s9  }
 0x290   : > { %p9_p4 = scmp.ge.s32.totalorder %s12_s9, 4  }
 0x292   :  { %11 = sbr.rel (!%p9_p4) target bundleno = 1 (0x1), region = 60 }

</bundles_post_ra>
